<compile_context>
chip_gen: v5e
topology: v5e:2x2
jax: 0.10.0
libtpu: 0.0.40
codegen_flags: <defaults>
</compile_context>

<pallas_src>
import math

import jax
import jax.numpy as jnp
from jax.experimental import pallas as pl
from jax.experimental.pallas import tpu as pltpu


def _round_up(x, m):
    return ((x + m - 1) // m) * m


def _pad_dim_for_mxu(dim):
    # <=128: one 128-wide MXU pass (native on v5e); >128: fill v6e/v7x's
    # 256-wide passes.  Zero padding keeps the math exact after slicing.
    return _round_up(dim, 128) if dim <= 128 else _round_up(dim, 256)


def _vmem_capacity_bytes():
    """Per-core VMEM capacity (128 MiB on v5e/v6e, 64 MiB per TC on v7x)."""
    try:
        return int(pltpu.get_tpu_info().vmem_capacity_bytes)
    except Exception:
        return 64 * 1024 * 1024   # conservative (v7x per-TensorCore) fallback


# ------------------------------------------------------------------ kernel --

def _fused_cae_kernel(x_ref, sel_ref, w1_ref, b1_ref, w2_ref, b2_ref,
                      xsel_ref, xrec_ref):
    """Per N-tile: x_sel = x @ sel ; x_recon = relu(x_sel @ W1 + b1) @ W2 + b2.

    x arrives as f32 and is cast to the compute dtype in VMEM; all matmuls
    accumulate in f32 on the MXU; bias add / ReLU stay f32 on the VPU.
    """
    x = x_ref[...].astype(sel_ref.dtype)
    y = jnp.dot(x, sel_ref[...], preferred_element_type=jnp.float32)     # (tn, Kp)
    xsel_ref[...] = y.astype(xsel_ref.dtype)
    h = jnp.dot(y.astype(w1_ref.dtype), w1_ref[...],
                preferred_element_type=jnp.float32)                      # (tn, Hp)
    h = jnp.maximum(h + b1_ref[...], 0.0)
    o = jnp.dot(h.astype(w2_ref.dtype), w2_ref[...],
                preferred_element_type=jnp.float32)                      # (tn, Dp)
    xrec_ref[...] = (o + b2_ref[...]).astype(xrec_ref.dtype)


# ----------------------------------------------------------------- wrapper --

def get_temp(epoch, n_epochs, start_temp=10.0, min_temp=0.05):
    """Exponential temperature schedule (ConcreteSelectLayer.get_temp, 'exp').

    NOTE: epoch / n_epochs must be static Python scalars (host-side float
    math, mirroring the torch module); do not pass traced values.
    """
    return max(min_temp, start_temp * (min_temp / start_temp) ** (epoch / n_epochs))


def _choose_tile_n(n, d, kp, hp, dp, x_bytes, cbytes, budget_bytes):
    """Largest power-of-two N tile whose working set fits the VMEM budget,
    while keeping >= 2 grid steps (megacore / second v7x TensorCore)."""
    # Resident (single-buffered) operands: selection, W1, b1, W2, b2.
    resident = (d * kp + kp * hp + hp * dp) * cbytes + (hp + dp) * 4
    max_tile = _round_up(max(8, -(-n // 2)), 8) if n > 8 else 8
    for cand in (1024, 512, 256, 128, 64, 32, 16, 8):
        if cand > max_tile:
            continue
        per_tile = cand * (
            2 * d * x_bytes             # x tile, double buffered (f32 HBM read)
            + 2 * (kp + dp) * cbytes    # x_sel / x_recon tiles, double buffered
            + (kp + hp + dp) * 4        # f32 matmul accumulators
            + d * cbytes)               # in-VMEM cast copy of the x tile
        if resident + per_tile <= budget_bytes:
            return cand
    return 8


def cae_forward(x, params, epoch, n_epochs, gumbel,
                start_temp=10.0, min_temp=0.05,
                compute_dtype=jnp.bfloat16,
                tile_n=None):
    """CAE.forward (no preselected genes, training=True): returns (x_recon, x_sel)."""
    n, d = x.shape
    d2, k = params["logits"].shape
    k2, h = params["w1"].shape
    h2, d3 = params["w2"].shape
    assert d == d2 and k == k2 and h == h2 and d == d3

    cbytes = jnp.dtype(compute_dtype).itemsize
    x_bytes = jnp.dtype(x.dtype).itemsize

    # --- lane/MXU padding of the narrow K, H dims and the decoder output D ---
    kp = _pad_dim_for_mxu(k)
    hp = _pad_dim_for_mxu(h)
    dp = _round_up(d, 128)

    w1_p = jnp.pad(params["w1"].astype(jnp.float32),
                   ((0, kp - k), (0, hp - h))).astype(compute_dtype)
    b1_p = jnp.pad(params["b1"].reshape(1, -1).astype(jnp.float32),
                   ((0, 0), (0, hp - h)))
    w2_p = jnp.pad(params["w2"].astype(jnp.float32),
                   ((0, hp - h), (0, dp - d))).astype(compute_dtype)
    b2_p = jnp.pad(params["b2"].reshape(1, -1).astype(jnp.float32),
                   ((0, 0), (0, dp - d)))

    # --- temperature schedule (static python scalar, like the torch module) ---
    temp = get_temp(epoch, n_epochs, start_temp, min_temp)

    # --- (1) gumbel-softmax selection: plain JAX, padded AFTER the softmax so
    #         the padded K columns are exactly zero (axis-0 softmax must see
    #         only the real D rows / K columns). ---
    sel = jax.nn.softmax(
        (params["logits"].astype(jnp.float32) + gumbel.astype(jnp.float32)) / temp,
        axis=0)
    sel_p = jnp.pad(sel, ((0, 0), (0, kp - k))).astype(compute_dtype)

    # --- (2) fused select + decode, tiled & pipelined over N ---
    vmem_cap = _vmem_capacity_bytes()
    if tile_n is None:
        tile_n = _choose_tile_n(n, d, kp, hp, dp, x_bytes, cbytes,
                                int(0.75 * vmem_cap))
    tile_n = max(8, _round_up(int(tile_n), 8))
    num_tiles = -(-n // tile_n)        # ragged last block: Pallas clips it

    resident_vmem = (d * kp + kp * hp + hp * dp) * cbytes + (hp + dp) * 4
    per_tile_vmem = tile_n * (2 * d * x_bytes + 2 * (kp + dp) * cbytes
                              + (kp + hp + dp) * 4 + d * cbytes)
    vmem_limit = int(min(vmem_cap,
                         max(32 << 20, resident_vmem + per_tile_vmem + (8 << 20))))

    flops = 2 * n * (d * kp + kp * hp + hp * dp)
    bytes_accessed = n * d * x_bytes + resident_vmem + n * (kp + dp) * cbytes

    def build(single_buffer_residents):
        res_kw = ({"pipeline_mode": pl.Buffered(1)}
                  if single_buffer_residents else {})
        return pl.pallas_call(
            _fused_cae_kernel,
            out_shape=(
                jax.ShapeDtypeStruct((n, kp), compute_dtype),
                jax.ShapeDtypeStruct((n, dp), compute_dtype),
            ),
            grid=(num_tiles,),
            in_specs=[
                # TODO(synk): if profiling at large D shows exposed x-tile DMA,
                #             raise this spec to pipeline_mode=pl.Buffered(3).
                pl.BlockSpec((tile_n, d), lambda i: (i, 0)),          # x (streamed f32)
                pl.BlockSpec((d, kp), lambda i: (0, 0), **res_kw),    # selection (resident)
                pl.BlockSpec((kp, hp), lambda i: (0, 0), **res_kw),   # W1 (resident)
                pl.BlockSpec((1, hp), lambda i: (0, 0), **res_kw),    # b1
                pl.BlockSpec((hp, dp), lambda i: (0, 0), **res_kw),   # W2 (resident)
                pl.BlockSpec((1, dp), lambda i: (0, 0), **res_kw),    # b2
            ],
            out_specs=(
                pl.BlockSpec((tile_n, kp), lambda i: (i, 0)),         # x_sel tile
                pl.BlockSpec((tile_n, dp), lambda i: (i, 0)),         # x_recon tile
            ),
            compiler_params=pltpu.CompilerParams(
                dimension_semantics=("parallel",),
                vmem_limit_bytes=vmem_limit,
            ),
            cost_estimate=pl.CostEstimate(
                flops=flops, transcendentals=0, bytes_accessed=bytes_accessed),
        )

    args = (x, sel_p, w1_p, b1_p, w2_p, b2_p)
    try:
        x_sel_p, x_rec_p = jax.block_until_ready(build(True)(*args))
    except Exception:
        # Fallback for jax versions without BlockSpec.pipeline_mode support:
        # default double-buffered resident operands (costs VMEM only).
        x_sel_p, x_rec_p = build(False)(*args)

    return x_rec_p[:, :d], x_sel_p[:, :k]


# --------------------------------------------------------------------- main --

if __name__ == "__main__":
    # Small, deterministic synthetic setup consistent with the module:
    #   adata: N=200 cells x D=64 genes; k=32 selected genes; decoder hidden=64
    N, D, K, H = 200, 64, 32, 64
    N_EPOCHS = 300
    key = jax.random.PRNGKey(0)
    kx, klogits, kg, kw1, kw2 = jax.random.split(key, 5)

    x = jax.random.normal(kx, (N, D), dtype=jnp.float32)

    # ConcreteSelectLayer.logits: xavier_normal_ on (input_dim, k)
    xavier_std = math.sqrt(2.0 / (D + K))
    logits = xavier_std * jax.random.normal(klogits, (D, K), dtype=jnp.float32)

    # Gumbel noise for F.gumbel_softmax (sampled once, passed into the wrapper).
    gumbel = jax.random.gumbel(kg, (D, K), dtype=jnp.float32)

    # Synthetic decoder_model: Linear(K, H) -> ReLU -> Linear(H, D)
    params = {
        "logits": logits,
        "w1": (1.0 / math.sqrt(K)) * jax.random.normal(kw1, (K, H), dtype=jnp.float32),
        "b1": 0.01 * jnp.ones((H,), jnp.float32),
        "w2": (1.0 / math.sqrt(H)) * jax.random.normal(kw2, (H, D), dtype=jnp.float32),
        "b2": 0.01 * jnp.ones((D,), jnp.float32),
    }

    # Plain-JAX f32 reference of the same math.
    temp = get_temp(5, N_EPOCHS)
    sel_ref = jax.nn.softmax((logits + gumbel) / temp, axis=0)
    x_sel_ref = x @ sel_ref
    h_ref = jnp.maximum(x_sel_ref @ params["w1"] + params["b1"][None, :], 0.0)
    x_recon_ref = h_ref @ params["w2"] + params["b2"][None, :]

    # (a) f32 path, explicit tile_n=128 -> 2 grid steps with a ragged 72-row
    #     last block: exercises store clipping + exact-semantics check.
    xr32, xs32 = cae_forward(x, params, epoch=5, n_epochs=N_EPOCHS, gumbel=gumbel,
                             compute_dtype=jnp.float32, tile_n=128)
    jax.block_until_ready((xr32, xs32))
    assert xr32.shape == (N, D) and xs32.shape == (N, K)
    assert jnp.allclose(xs32, x_sel_ref, atol=1e-4)
    assert jnp.allclose(xr32, x_recon_ref, atol=1e-3)

    # (b) default bf16 path (bf16 operands + bf16 outputs, f32 accumulate),
    #     auto-sized tile (>= 2 grid steps guaranteed).
    xrb, xsb = cae_forward(x, params, epoch=5, n_epochs=N_EPOCHS, gumbel=gumbel,
                           compute_dtype=jnp.bfloat16)
    jax.block_until_ready((xrb, xsb))
    assert xrb.shape == (N, D) and xsb.shape == (N, K)
    assert jnp.allclose(xsb.astype(jnp.float32), x_sel_ref, atol=5e-2)
    assert jnp.allclose(xrb.astype(jnp.float32), x_recon_ref, atol=1e-1)

    print("KERNEL_OK")
</pallas_src>

<mosaic_0001>
module attributes {stable_mosaic.version = 11 : i64} {
  func.func @_fused_cae_kernel(%arg0: i32, %arg1: memref<128x64xf32, #tpu.memory_space<vmem>>, %arg2: memref<64x128xf32, #tpu.memory_space<vmem>>, %arg3: memref<128x128xf32, #tpu.memory_space<vmem>>, %arg4: memref<1x128xf32, #tpu.memory_space<vmem>>, %arg5: memref<128x128xf32, #tpu.memory_space<vmem>>, %arg6: memref<1x128xf32, #tpu.memory_space<vmem>>, %arg7: memref<128x128xf32, #tpu.memory_space<vmem>>, %arg8: memref<128x128xf32, #tpu.memory_space<vmem>>) attributes {dimension_semantics = [#tpu.dimension_semantics<parallel>], iteration_bounds = array<i64: 2>, scalar_prefetch = 0 : i64, scratch_operands = 0 : i64, tpu.core_type = #tpu.core_type<tc>, window_params = [{transform_indices = @transform_0, window_bounds = array<i64: 128, 64>}, {pipeline_mode = #tpu.pipeline_mode<synchronous>, transform_indices = @transform_1, window_bounds = array<i64: 64, 128>}, {pipeline_mode = #tpu.pipeline_mode<synchronous>, transform_indices = @transform_2, window_bounds = array<i64: 128, 128>}, {pipeline_mode = #tpu.pipeline_mode<synchronous>, transform_indices = @transform_3, window_bounds = array<i64: 1, 128>}, {pipeline_mode = #tpu.pipeline_mode<synchronous>, transform_indices = @transform_4, window_bounds = array<i64: 128, 128>}, {pipeline_mode = #tpu.pipeline_mode<synchronous>, transform_indices = @transform_5, window_bounds = array<i64: 1, 128>}, {transform_indices = @transform_6, window_bounds = array<i64: 128, 128>}, {transform_indices = @transform_7, window_bounds = array<i64: 128, 128>}]} {
    %c0 = arith.constant 0 : index
    %c0_0 = arith.constant 0 : index
    %0 = vector.load %arg1[%c0, %c0_0] : memref<128x64xf32, #tpu.memory_space<vmem>>, vector<128x64xf32>
    %c0_1 = arith.constant 0 : index
    %c0_2 = arith.constant 0 : index
    %1 = vector.load %arg2[%c0_1, %c0_2] : memref<64x128xf32, #tpu.memory_space<vmem>>, vector<64x128xf32>
    %cst = arith.constant dense<0.000000e+00> : vector<128x128xf32>
    %2 = tpu.matmul %0, %1, %cst {dimension_numbers = #tpu.dot_dimension_numbers<[1], [0], [0], [1], [0, 0, 1, 1], [], []>} : vector<128x64xf32>, vector<64x128xf32>, vector<128x128xf32> -> vector<128x128xf32>
    %c0_3 = arith.constant 0 : index
    %c0_4 = arith.constant 0 : index
    %3 = vector.load %arg7[%c0_3, %c0_4] : memref<128x128xf32, #tpu.memory_space<vmem>>, vector<128x128xf32>
    tpu.vector_store %arg7[%c0_3, %c0_4], %2 {strides = array<i32>} : memref<128x128xf32, #tpu.memory_space<vmem>>, vector<128x128xf32>,
    %c0_5 = arith.constant 0 : index
    %c0_6 = arith.constant 0 : index
    %4 = vector.load %arg3[%c0_5, %c0_6] : memref<128x128xf32, #tpu.memory_space<vmem>>, vector<128x128xf32>
    %cst_7 = arith.constant dense<0.000000e+00> : vector<128x128xf32>
    %5 = tpu.matmul %2, %4, %cst_7 {dimension_numbers = #tpu.dot_dimension_numbers<[1], [0], [0], [1], [0, 0, 1, 1], [], []>} : vector<128x128xf32>, vector<128x128xf32>, vector<128x128xf32> -> vector<128x128xf32>
    %c0_8 = arith.constant 0 : index
    %c0_9 = arith.constant 0 : index
    %6 = vector.load %arg4[%c0_8, %c0_9] : memref<1x128xf32, #tpu.memory_space<vmem>>, vector<1x128xf32>
    %7 = vector.broadcast %6 : vector<1x128xf32> to vector<128x128xf32>
    %8 = arith.addf %5, %7 : vector<128x128xf32>
    %cst_10 = arith.constant 0.000000e+00 : f32
    %9 = vector.broadcast %cst_10 : f32 to vector<128x128xf32>
    %10 = arith.maximumf %8, %9 : vector<128x128xf32>
    %c0_11 = arith.constant 0 : index
    %c0_12 = arith.constant 0 : index
    %11 = vector.load %arg5[%c0_11, %c0_12] : memref<128x128xf32, #tpu.memory_space<vmem>>, vector<128x128xf32>
    %cst_13 = arith.constant dense<0.000000e+00> : vector<128x128xf32>
    %12 = tpu.matmul %10, %11, %cst_13 {dimension_numbers = #tpu.dot_dimension_numbers<[1], [0], [0], [1], [0, 0, 1, 1], [], []>} : vector<128x128xf32>, vector<128x128xf32>, vector<128x128xf32> -> vector<128x128xf32>
    %c0_14 = arith.constant 0 : index
    %c0_15 = arith.constant 0 : index
    %13 = vector.load %arg6[%c0_14, %c0_15] : memref<1x128xf32, #tpu.memory_space<vmem>>, vector<1x128xf32>
    %14 = vector.broadcast %13 : vector<1x128xf32> to vector<128x128xf32>
    %15 = arith.addf %12, %14 : vector<128x128xf32>
    %c0_16 = arith.constant 0 : index
    %c0_17 = arith.constant 0 : index
    %16 = vector.load %arg8[%c0_16, %c0_17] : memref<128x128xf32, #tpu.memory_space<vmem>>, vector<128x128xf32>
    tpu.vector_store %arg8[%c0_16, %c0_17], %15 {strides = array<i32>} : memref<128x128xf32, #tpu.memory_space<vmem>>, vector<128x128xf32>,
    return
  }
  func.func @transform_0(%arg0: i32) -> (i32, i32) {
    %c0_i32 = arith.constant 0 : i32
    %c0_i32_0 = arith.constant 0 : i32
    return %arg0, %c0_i32 : i32, i32
  }
  func.func @transform_1(%arg0: i32) -> (i32, i32) {
    %c0_i32 = arith.constant 0 : i32
    %c0_i32_0 = arith.constant 0 : i32
    %c0_i32_1 = arith.constant 0 : i32
    return %c0_i32, %c0_i32_0 : i32, i32
  }
  func.func @transform_2(%arg0: i32) -> (i32, i32) {
    %c0_i32 = arith.constant 0 : i32
    %c0_i32_0 = arith.constant 0 : i32
    %c0_i32_1 = arith.constant 0 : i32
    return %c0_i32, %c0_i32_0 : i32, i32
  }
  func.func @transform_3(%arg0: i32) -> (i32, i32) {
    %c0_i32 = arith.constant 0 : i32
    %c0_i32_0 = arith.constant 0 : i32
    %c0_i32_1 = arith.constant 0 : i32
    return %c0_i32, %c0_i32_0 : i32, i32
  }
  func.func @transform_4(%arg0: i32) -> (i32, i32) {
    %c0_i32 = arith.constant 0 : i32
    %c0_i32_0 = arith.constant 0 : i32
    %c0_i32_1 = arith.constant 0 : i32
    return %c0_i32, %c0_i32_0 : i32, i32
  }
  func.func @transform_5(%arg0: i32) -> (i32, i32) {
    %c0_i32 = arith.constant 0 : i32
    %c0_i32_0 = arith.constant 0 : i32
    %c0_i32_1 = arith.constant 0 : i32
    return %c0_i32, %c0_i32_0 : i32, i32
  }
  func.func @transform_6(%arg0: i32) -> (i32, i32) {
    %c0_i32 = arith.constant 0 : i32
    %c0_i32_0 = arith.constant 0 : i32
    return %arg0, %c0_i32 : i32, i32
  }
  func.func @transform_7(%arg0: i32) -> (i32, i32) {
    %c0_i32 = arith.constant 0 : i32
    %c0_i32_0 = arith.constant 0 : i32
    return %arg0, %c0_i32 : i32, i32
  }
}

module attributes {stable_mosaic.version = 11 : i64} {
  func.func @_fused_cae_kernel(%arg0: i32, %arg1: memref<128x64xf32, #tpu.memory_space<vmem>>, %arg2: memref<64x128xf32, #tpu.memory_space<vmem>>, %arg3: memref<128x128xf32, #tpu.memory_space<vmem>>, %arg4: memref<1x128xf32, #tpu.memory_space<vmem>>, %arg5: memref<128x128xf32, #tpu.memory_space<vmem>>, %arg6: memref<1x128xf32, #tpu.memory_space<vmem>>, %arg7: memref<128x128xf32, #tpu.memory_space<vmem>>, %arg8: memref<128x128xf32, #tpu.memory_space<vmem>>) attributes {dimension_semantics = [#tpu.dimension_semantics<parallel>], iteration_bounds = array<i64: 2>, scalar_prefetch = 0 : i64, scratch_operands = 0 : i64, tpu.core_type = #tpu.core_type<tc>, window_params = [{transform_indices = @transform_0, window_bounds = array<i64: 128, 64>}, {pipeline_mode = #tpu.pipeline_mode<synchronous>, transform_indices = @transform_1, window_bounds = array<i64: 64, 128>}, {pipeline_mode = #tpu.pipeline_mode<synchronous>, transform_indices = @transform_2, window_bounds = array<i64: 128, 128>}, {pipeline_mode = #tpu.pipeline_mode<synchronous>, transform_indices = @transform_3, window_bounds = array<i64: 1, 128>}, {pipeline_mode = #tpu.pipeline_mode<synchronous>, transform_indices = @transform_4, window_bounds = array<i64: 128, 128>}, {pipeline_mode = #tpu.pipeline_mode<synchronous>, transform_indices = @transform_5, window_bounds = array<i64: 1, 128>}, {transform_indices = @transform_6, window_bounds = array<i64: 128, 128>}, {transform_indices = @transform_7, window_bounds = array<i64: 128, 128>}]} {
    %c0 = arith.constant 0 : index
    %c0_0 = arith.constant 0 : index
    %0 = vector.load %arg1[%c0, %c0_0] : memref<128x64xf32, #tpu.memory_space<vmem>>, vector<128x64xf32>
    %c0_1 = arith.constant 0 : index
    %c0_2 = arith.constant 0 : index
    %1 = vector.load %arg2[%c0_1, %c0_2] : memref<64x128xf32, #tpu.memory_space<vmem>>, vector<64x128xf32>
    %cst = arith.constant dense<0.000000e+00> : vector<128x128xf32>
    %2 = tpu.matmul %0, %1, %cst {dimension_numbers = #tpu.dot_dimension_numbers<[1], [0], [0], [1], [0, 0, 1, 1], [], []>} : vector<128x64xf32>, vector<64x128xf32>, vector<128x128xf32> -> vector<128x128xf32>
    %c0_3 = arith.constant 0 : index
    %c0_4 = arith.constant 0 : index
    %3 = vector.load %arg7[%c0_3, %c0_4] : memref<128x128xf32, #tpu.memory_space<vmem>>, vector<128x128xf32>
    tpu.vector_store %arg7[%c0_3, %c0_4], %2 {strides = array<i32>} : memref<128x128xf32, #tpu.memory_space<vmem>>, vector<128x128xf32>,
    %c0_5 = arith.constant 0 : index
    %c0_6 = arith.constant 0 : index
    %4 = vector.load %arg3[%c0_5, %c0_6] : memref<128x128xf32, #tpu.memory_space<vmem>>, vector<128x128xf32>
    %cst_7 = arith.constant dense<0.000000e+00> : vector<128x128xf32>
    %5 = tpu.matmul %2, %4, %cst_7 {dimension_numbers = #tpu.dot_dimension_numbers<[1], [0], [0], [1], [0, 0, 1, 1], [], []>} : vector<128x128xf32>, vector<128x128xf32>, vector<128x128xf32> -> vector<128x128xf32>
    %c0_8 = arith.constant 0 : index
    %c0_9 = arith.constant 0 : index
    %6 = vector.load %arg4[%c0_8, %c0_9] : memref<1x128xf32, #tpu.memory_space<vmem>>, vector<1x128xf32>
    %7 = vector.broadcast %6 : vector<1x128xf32> to vector<128x128xf32>
    %8 = arith.addf %5, %7 : vector<128x128xf32>
    %cst_10 = arith.constant 0.000000e+00 : f32
    %9 = vector.broadcast %cst_10 : f32 to vector<128x128xf32>
    %10 = arith.maximumf %8, %9 : vector<128x128xf32>
    %c0_11 = arith.constant 0 : index
    %c0_12 = arith.constant 0 : index
    %11 = vector.load %arg5[%c0_11, %c0_12] : memref<128x128xf32, #tpu.memory_space<vmem>>, vector<128x128xf32>
    %cst_13 = arith.constant dense<0.000000e+00> : vector<128x128xf32>
    %12 = tpu.matmul %10, %11, %cst_13 {dimension_numbers = #tpu.dot_dimension_numbers<[1], [0], [0], [1], [0, 0, 1, 1], [], []>} : vector<128x128xf32>, vector<128x128xf32>, vector<128x128xf32> -> vector<128x128xf32>
    %c0_14 = arith.constant 0 : index
    %c0_15 = arith.constant 0 : index
    %13 = vector.load %arg6[%c0_14, %c0_15] : memref<1x128xf32, #tpu.memory_space<vmem>>, vector<1x128xf32>
    %14 = vector.broadcast %13 : vector<1x128xf32> to vector<128x128xf32>
    %15 = arith.addf %12, %14 : vector<128x128xf32>
    %c0_16 = arith.constant 0 : index
    %c0_17 = arith.constant 0 : index
    %16 = vector.load %arg8[%c0_16, %c0_17] : memref<128x128xf32, #tpu.memory_space<vmem>>, vector<128x128xf32>
    tpu.vector_store %arg8[%c0_16, %c0_17], %15 {strides = array<i32>} : memref<128x128xf32, #tpu.memory_space<vmem>>, vector<128x128xf32>,
    return
  }
  func.func @transform_0(%arg0: i32) -> (i32, i32) {
    %c0_i32 = arith.constant 0 : i32
    %c0_i32_0 = arith.constant 0 : i32
    return %arg0, %c0_i32 : i32, i32
  }
  func.func @transform_1(%arg0: i32) -> (i32, i32) {
    %c0_i32 = arith.constant 0 : i32
    %c0_i32_0 = arith.constant 0 : i32
    %c0_i32_1 = arith.constant 0 : i32
    return %c0_i32, %c0_i32_0 : i32, i32
  }
  func.func @transform_2(%arg0: i32) -> (i32, i32) {
    %c0_i32 = arith.constant 0 : i32
    %c0_i32_0 = arith.constant 0 : i32
    %c0_i32_1 = arith.constant 0 : i32
    return %c0_i32, %c0_i32_0 : i32, i32
  }
  func.func @transform_3(%arg0: i32) -> (i32, i32) {
    %c0_i32 = arith.constant 0 : i32
    %c0_i32_0 = arith.constant 0 : i32
    %c0_i32_1 = arith.constant 0 : i32
    return %c0_i32, %c0_i32_0 : i32, i32
  }
  func.func @transform_4(%arg0: i32) -> (i32, i32) {
    %c0_i32 = arith.constant 0 : i32
    %c0_i32_0 = arith.constant 0 : i32
    %c0_i32_1 = arith.constant 0 : i32
    return %c0_i32, %c0_i32_0 : i32, i32
  }
  func.func @transform_5(%arg0: i32) -> (i32, i32) {
    %c0_i32 = arith.constant 0 : i32
    %c0_i32_0 = arith.constant 0 : i32
    %c0_i32_1 = arith.constant 0 : i32
    return %c0_i32, %c0_i32_0 : i32, i32
  }
  func.func @transform_6(%arg0: i32) -> (i32, i32) {
    %c0_i32 = arith.constant 0 : i32
    %c0_i32_0 = arith.constant 0 : i32
    return %arg0, %c0_i32 : i32, i32
  }
  func.func @transform_7(%arg0: i32) -> (i32, i32) {
    %c0_i32 = arith.constant 0 : i32
    %c0_i32_0 = arith.constant 0 : i32
    return %arg0, %c0_i32 : i32, i32
  }
}

</mosaic_0001>

<bundles_post_ra>
// kernel: tpu_custom_call.1
= control target key start
LH: loop header
LB: loop body
LE: loop exit
PB: predicated region body
PF: predicated region fallthrough
CT: control target
= control target key end

     0   :  { %s1476_s0 = inlined_call_operand.vmem [shape: f32[200,64], index: 0, kind: input, shape index: {}]   ;;  %s1477_s1 = inlined_call_operand.vmem [shape: f32[64,128], index: 1, kind: input, shape index: {}]   ;;  %s1478_s2 = inlined_call_operand.vmem [shape: f32[128,128], index: 2, kind: input, shape index: {}]   ;;  %s1479_s3 = inlined_call_operand.vmem [shape: f32[1,128], index: 3, kind: input, shape index: {}]   ;;  %s1480_s4 = inlined_call_operand.vmem [shape: f32[128,128], index: 4, kind: input, shape index: {}]   ;;  %s1481_s5 = inlined_call_operand.vmem [shape: f32[1,128], index: 5, kind: input, shape index: {}]   ;;  %s1482_s6 = inlined_call_operand.hbm [shape: f32[200,128], index: 6, kind: output, shape index: {0}]   ;;  %s1483_s7 = inlined_call_operand.hbm [shape: f32[200,128], index: 7, kind: output, shape index: {1}]  }
   0x1   :  { %1486 = sst [smem:[#allocation8_spill]] %s1476_s0 }
   0x2   :  { %1487 = sst [smem:[#allocation9_spill]] %s1477_s1 }
   0x3   :  { %1488 = sst [smem:[#allocation10_spill]] %s1478_s2 }
   0x4   :  { %1489 = sst [smem:[#allocation11_spill]] %s1479_s3 }
   0x5   :  { %13 = vsyncpa [#allocation3], 0 }
   0x6   :  { %15 = vsyncpa [#allocation3 + $0x1], 0 }
   0x7   :  { %16 = vsyncpa [#allocation5], 0 }
   0x8   :  { %18 = vsyncpa [#allocation5 + $0x1], 0  ;;  %s1109_s24 = smov 0   ;;  %s1111_s25 = smov 0  }
   0x9   :  { %s1113_s26 = smov 0   ;;  %s1115_s27 = smov 0  }
   0xa LB: > { %s1130_s28 = sadd.s32 4294967295, %s1061_s27   ;;  %s823_s29 = sadd.s32 4294967294, %s1061_s27   ;;  %s1061_s27 = sphi %s1115_s27, %s1505_s27   ;;  %s1057_s26 = sphi %s1113_s26, %s1504_s26   ;;  %s1053_s25 = sphi %s1111_s25, %s1503_s25   ;;  %s1049_s24 = sphi %s1109_s24, %s1502_s24  }
   0xb   : > { %s1134_s30 = sadd.s32 1, %s1061_s27   ;;  %s162_s8 = sadd.s32 1, %s1057_s26 }
   0xc   : > { %s159_s9 = ssub.s32 %s1061_s27, %s1134_s30  ;;  %p172_p0 = scmp.ne.s32.totalorder %s1057_s26, %s1053_s25 }
   0xd   : > { %p160_p1 = scmp.eq.s32.totalorder %s159_s9, 0  ;;  %p173_p2 = scmp.eq.s32.totalorder %s1130_s28, 1 }
   0xe   : > { %p178_p3 = scmp.ne.s32.totalorder %s1053_s25, %s1049_s24  ;;  %p179_p4 = scmp.eq.s32.totalorder %s823_s29, 1 }
   0xf   : > { %s1145_s10 = scalar_select %p160_p1, %s1057_s26, %s162_s8  }
  0x10   : > { %p1147_p5 = por %p173_p2, %p172_p0  ;;  %p1151_p6 = por %p179_p4, %p178_p3 }
  0x11   : > { %p826_p7 = scmp.ge.s32.totalorder %s1061_s27, 1  ;;  %p255_p8 = scmp.lt.s32.totalorder %s1061_s27, 3 }
  0x13   : > { %p256_p9 = pnand %p826_p7, %p255_p8 }
  0x14   : > { %s1492_s1 = sld [smem:[#allocation9_spill]] (!%p256_p9)  ;;  %s1164_s17 = sshll.u32 (!%p256_p9), %s1130_s28, 4 }
  0x15   : > { %259 = sbr.rel (%p256_p9) target bundleno = 628 (0x274), region = 44  ;;  %p301_p10 = scmp.lt.s32.totalorder (!%p256_p9), %s1164_s17, 24 }
  0x16   : > { %s1493_s0 = sld [smem:[#allocation8_spill]] (!%p256_p9)  ;;  %s1193_s22 = sand.u32 (!%p256_p9), 1, %s1053_s25  }
  0x17   : > { %s1494_s2 = sld [smem:[#allocation10_spill]] (!%p256_p9)  ;;  %s827_s21 = sshll.u32 (!%p256_p9), %s1193_s22, 7 }
  0x18   : > { %s1277_s23 = scalar_lea.vmem (!%p256_p9), [#allocation2], %s827_s21  ;;  %s1495_s3 = sld [smem:[#allocation11_spill]] (!%p256_p9) }
  0x19   : > { %s1351_s15 = scalar_lea.vmem (!%p256_p9), [#allocation4], %s827_s21  ;;  %s1484_s21 = scalar_lea.sflag (!%p256_p9), [#allocation3], %s1193_s22 }
  0x1a   : > { %v343_v0 = vld [vmem:[%s1492_s1 + $0x38] sm:$0xff]  ;;  %v342_v1 = vld [vmem:[%s1492_s1 + $0x30] sm:$0xff]  ;;  %v341_v2 = vld [vmem:[%s1492_s1 + $0x28] sm:$0xff]  ;;  %s302_s20 = scalar_select %p301_p10, %s1164_s17, 24  ;;  %vm344_vm0 = vcmask 523264  }
  0x1b   : > { %401 = vmatpush.msra.mxu0 %v343_v0  ;;  %v340_v3 = vld [vmem:[%s1492_s1 + $0x20] sm:$0xff]  ;;  %v339_v4 = vld [vmem:[%s1492_s1 + $0x18] sm:$0xff]  ;;  %v338_v5 = vld [vmem:[%s1492_s1 + $0x10] sm:$0xff]  ;;  %s690_s18 = ssub.s32 (%p1147_p5), 25, %s1164_s17 }
  0x1c   : > { %s830_s8 = sshll.u32 %s302_s20, 3  ;;  %v337_v6 = vld [vmem:[%s1492_s1 + $0x8] sm:$0xff]  ;;  %v336_v7 = vld [vmem:[%s1492_s1] sm:$0xff]  ;;  %v590_v49 = vld [vmem:[%s1480_s4 + $0x78] sm:$0xff]  ;;  %p691_p11 = scmp.lt.s32.totalorder (%p1147_p5), %s690_s18, 16 }
  0x1d   : > { %402 = vmatpush.msra.mxu0 %v342_v1  ;;  %s1186_s19 = scalar_lea.vmem %s1493_s0, %s830_s8  ;;  %v489_v16 = vld [vmem:[%s1494_s2 + $0x78] sm:$0xff]  ;;  %v488_v18 = vld [vmem:[%s1494_s2 + $0x70] sm:$0xff]  ;;  %v487_v19 = vld [vmem:[%s1494_s2 + $0x68] sm:$0xff]  ;;  %595 = vmatpush.msra.mxu2 %v590_v49 }
  0x1e   : > { %v320_v8 = vld [vmem:[%s1186_s19] sm:$0xff]  ;;  %v321_v9 = vld [vmem:[%s1186_s19 + $0x8] sm:$0xff]  ;;  %v322_v10 = vld [vmem:[%s1186_s19 + $0x10] sm:$0xff]  ;;  %494 = vmatpush.msra.mxu1 %v489_v16  ;;  %865 = vmatpush.msra.mxu3 %v489_v16 }
  0x1f   : > { %403 = vmatpush.msra.mxu0 %v341_v2  ;;  %v323_v11 = vld [vmem:[%s1186_s19 + $0x18] sm:$0xff]  ;;  %v324_v12 = vld [vmem:[%s1186_s19 + $0x20] sm:$0xff]  ;;  %v325_v13 = vld [vmem:[%s1186_s19 + $0x28] sm:$0xff] }
  0x20   : > { %v326_v14 = vld [vmem:[%s1186_s19 + $0x30] sm:$0xff]  ;;  %v327_v15 = vld [vmem:[%s1186_s19 + $0x38] sm:$0xff]  ;;  %v328_v17 = vld [vmem:[%s1186_s19 + $0x40] sm:$0xff]  ;;  %495 = vmatpush.msra.mxu1 %v488_v18  ;;  %866 = vmatpush.msra.mxu3 %v488_v18 }
  0x21   : > { %404 = vmatpush.msra.mxu0 %v340_v3  ;;  %v486_v20 = vld [vmem:[%s1494_s2 + $0x60] sm:$0xff]  ;;  %v485_v21 = vld [vmem:[%s1494_s2 + $0x58] sm:$0xff]  ;;  %v329_v22 = vld [vmem:[%s1186_s19 + $0x48] sm:$0xff] }
  0x22   : > { %496 = vmatpush.msra.mxu1 %v487_v19  ;;  %867 = vmatpush.msra.mxu3 %v487_v19  ;;  %v484_v23 = vld [vmem:[%s1494_s2 + $0x50] sm:$0xff]  ;;  %v483_v24 = vld [vmem:[%s1494_s2 + $0x48] sm:$0xff]  ;;  %v482_v25 = vld [vmem:[%s1494_s2 + $0x40] sm:$0xff] }
  0x23   : > { %405 = vmatpush.msra.mxu0 %v339_v4  ;;  %v481_v26 = vld [vmem:[%s1494_s2 + $0x38] sm:$0xff]  ;;  %v330_v27 = vld [vmem:[%s1186_s19 + $0x50] sm:$0xff]  ;;  %v479_v29 = vld [vmem:[%s1494_s2 + $0x28] sm:$0xff] }
  0x24   : > { %497 = vmatpush.msra.mxu1 %v486_v20  ;;  %868 = vmatpush.msra.mxu3 %v486_v20  ;;  %v480_v28 = vld [vmem:[%s1494_s2 + $0x30] sm:$0xff]  ;;  %v478_v30 = vld [vmem:[%s1494_s2 + $0x20] sm:$0xff]  ;;  %v477_v31 = vld [vmem:[%s1494_s2 + $0x18] sm:$0xff] }
  0x25   : > { %406 = vmatpush.msra.mxu0 %v338_v5  ;;  %v331_v32 = vld [vmem:[%s1186_s19 + $0x58] sm:$0xff]  ;;  %v476_v33 = vld [vmem:[%s1494_s2 + $0x10] sm:$0xff]  ;;  %v475_v34 = vld [vmem:[%s1494_s2 + $0x8] sm:$0xff] }
  0x26   : > { %498 = vmatpush.msra.mxu1 %v485_v21  ;;  %869 = vmatpush.msra.mxu3 %v485_v21  ;;  %v474_v35 = vld [vmem:[%s1494_s2] sm:$0xff]  ;;  %v333_v37 = vld [vmem:[%s1186_s19 + $0x68] sm:$0xff]  ;;  %v334_v38 = vld [vmem:[%s1186_s19 + $0x70] sm:$0xff] }
  0x27   : > { %407 = vmatpush.msra.mxu0 %v337_v6  ;;  %v332_v36 = vld [vmem:[%s1186_s19 + $0x60] sm:$0xff]  ;;  %v335_v39 = vld [vmem:[%s1186_s19 + $0x78] sm:$0xff]  ;;  %v589_v50 = vld [vmem:[%s1480_s4 + $0x70] sm:$0xff] }
  0x28   : > { %499 = vmatpush.msra.mxu1 %v484_v23  ;;  %870 = vmatpush.msra.mxu3 %v484_v23  ;;  %v588_v51 = vld [vmem:[%s1480_s4 + $0x68] sm:$0xff]  ;;  %v587_v53 = vld [vmem:[%s1480_s4 + $0x60] sm:$0xff]  ;;  %v586_v54 = vld [vmem:[%s1480_s4 + $0x58] sm:$0xff] }
  0x29   : > { %408 = vmatpush.msra.mxu0 %v336_v7  ;;  %596 = vmatpush.msra.mxu2 %v589_v50  ;;  %v585_v55 = vld [vmem:[%s1480_s4 + $0x50] sm:$0xff]  ;;  %v584_v56 = vld [vmem:[%s1480_s4 + $0x48] sm:$0xff]  ;;  %v583_v58 = vld [vmem:[%s1480_s4 + $0x40] sm:$0xff] }
  0x2a   : > { %831 = vmatmul.msk.f32.vlgmr.msra.gmra.mxu0 %vm344_vm0, %v320_v8  ;;  %500 = vmatpush.msra.mxu1 %v483_v24  ;;  %v582_v59 = vld [vmem:[%s1480_s4 + $0x38] sm:$0xff]  ;;  %v581_v60 = vld [vmem:[%s1480_s4 + $0x30] sm:$0xff]  ;;  %v580_v61 = vld [vmem:[%s1480_s4 + $0x28] sm:$0xff] }
  0x2b   : > { %871 = vmatpush.msra.mxu3 %v483_v24  ;;  %597 = vmatpush.msra.mxu2 %v588_v51  ;;  %v579_v63 = vld [vmem:[%s1480_s4 + $0x20] sm:$0xff]  ;;  %v578_v0 = vld [vmem:[%s1480_s4 + $0x18] sm:$0xff]  ;;  %v577_v1 = vld [vmem:[%s1480_s4 + $0x10] sm:$0xff] }
  0x2c   : > { %501 = vmatpush.msra.mxu1 %v482_v25  ;;  %v576_v2 = vld [vmem:[%s1480_s4 + $0x8] sm:$0xff]  ;;  %v575_v4 = vld [vmem:[%s1480_s4] sm:$0xff] }
  0x2d   : > { %872 = vmatpush.msra.mxu3 %v482_v25  ;;  %598 = vmatpush.msra.mxu2 %v587_v53  ;;  %v943_v8 = vld [vmem:[%s1495_s3] ss:$0 sm:$0xff] }
  0x2e   : > { %502 = vmatpush.msra.mxu1 %v481_v26 }
  0x2f   : > { %873 = vmatpush.msra.mxu3 %v481_v26  ;;  %599 = vmatpush.msra.mxu2 %v586_v54 }
  0x30   : > { %503 = vmatpush.msra.mxu1 %v480_v28 }
  0x31   : > { %874 = vmatpush.msra.mxu3 %v480_v28  ;;  %600 = vmatpush.msra.mxu2 %v585_v55 }
  0x32   : > { %832 = vmatmul.msk.f32.gmra.mxu0 %vm344_vm0, %v321_v9  ;;  %504 = vmatpush.msra.mxu1 %v479_v29 }
  0x33   : > { %875 = vmatpush.msra.mxu3 %v479_v29  ;;  %601 = vmatpush.msra.mxu2 %v584_v56 }
  0x34   : > { %505 = vmatpush.msra.mxu1 %v478_v30 }
  0x35   : > { %876 = vmatpush.msra.mxu3 %v478_v30  ;;  %602 = vmatpush.msra.mxu2 %v583_v58 }
  0x36   : > { %506 = vmatpush.msra.mxu1 %v477_v31 }
  0x37   : > { %877 = vmatpush.msra.mxu3 %v477_v31  ;;  %603 = vmatpush.msra.mxu2 %v582_v59 }
  0x38   : > { %507 = vmatpush.msra.mxu1 %v476_v33 }
  0x39   : > { %878 = vmatpush.msra.mxu3 %v476_v33  ;;  %604 = vmatpush.msra.mxu2 %v581_v60 }
  0x3a   : > { %833 = vmatmul.msk.f32.gmra.mxu0 %vm344_vm0, %v322_v10  ;;  %508 = vmatpush.msra.mxu1 %v475_v34 }
  0x3b   : > { %879 = vmatpush.msra.mxu3 %v475_v34  ;;  %605 = vmatpush.msra.mxu2 %v580_v61 }
  0x3c   : > { %509 = vmatpush.msra.mxu1 %v474_v35 }
  0x3d   : > { %880 = vmatpush.msra.mxu3 %v474_v35  ;;  %606 = vmatpush.msra.mxu2 %v579_v63 }
  0x3f   : > { %881 = vmatpush.msrb.mxu3 %v590_v49  ;;  %607 = vmatpush.msra.mxu2 %v578_v0 }
  0x41   : > { %882 = vmatpush.msrb.mxu3 %v589_v50  ;;  %608 = vmatpush.msra.mxu2 %v577_v1 }
  0x42   : > { %834 = vmatmul.msk.f32.gmra.mxu0 %vm344_vm0, %v323_v11 }
  0x43   : > { %883 = vmatpush.msrb.mxu3 %v588_v51  ;;  %609 = vmatpush.msra.mxu2 %v576_v2 }
  0x45   : > { %884 = vmatpush.msrb.mxu3 %v587_v53  ;;  %610 = vmatpush.msra.mxu2 %v575_v4 }
  0x47   : > { %885 = vmatpush.msrb.mxu3 %v586_v54 }
  0x49   : > { %886 = vmatpush.msrb.mxu3 %v585_v55 }
  0x4a   : > { %835 = vmatmul.msk.f32.gmra.mxu0 %vm344_vm0, %v324_v12 }
  0x4b   : > { %887 = vmatpush.msrb.mxu3 %v584_v56 }
  0x4d   : > { %888 = vmatpush.msrb.mxu3 %v583_v58 }
  0x4f   : > { %889 = vmatpush.msrb.mxu3 %v582_v59 }
  0x51   : > { %890 = vmatpush.msrb.mxu3 %v581_v60 }
  0x52   : > { %836 = vmatmul.msk.f32.gmra.mxu0 %vm344_vm0, %v325_v13 }
  0x53   : > { %891 = vmatpush.msrb.mxu3 %v580_v61 }
  0x55   : > { %892 = vmatpush.msrb.mxu3 %v579_v63 }
  0x57   : > { %893 = vmatpush.msrb.mxu3 %v578_v0 }
  0x59   : > { %894 = vmatpush.msrb.mxu3 %v577_v1 }
  0x5a   : > { %837 = vmatmul.msk.f32.gmra.mxu0 %vm344_vm0, %v326_v14 }
  0x5b   : > { %895 = vmatpush.msrb.mxu3 %v576_v2 }
  0x5d   : > { %896 = vmatpush.msrb.mxu3 %v575_v4 }
  0x62   : > { %838 = vmatmul.msk.f32.gmra.mxu0 %vm344_vm0, %v327_v15 }
  0x6a   : > { %839 = vmatmul.msk.f32.gmra.mxu0 %vm344_vm0, %v328_v17 }
  0x72   : > { %840 = vmatmul.msk.f32.gmra.mxu0 %vm344_vm0, %v329_v22 }
  0x7a   : > { %841 = vmatmul.msk.f32.gmra.mxu0 %vm344_vm0, %v330_v27 }
  0x82   : > { %842 = vmatmul.msk.f32.gmra.mxu0 %vm344_vm0, %v331_v32 }
  0x8a   : > { %843 = vmatmul.msk.f32.gmra.mxu0 %vm344_vm0, %v332_v36 }
  0x92   : > { %844 = vmatmul.msk.f32.gmra.mxu0 %vm344_vm0, %v333_v37 }
  0x9a   : > { %845 = vmatmul.msk.f32.gmra.mxu0 %vm344_vm0, %v334_v38 }
  0xa2   : > { %846 = vmatmul.msk.f32.gmra.mxu0 %vm344_vm0, %v335_v39 }
  0xa7   : > { %v410_v40 = vpop.f32.mrf.mxu0 }
  0xa8   : > { %458 = vst [vmem:[%s1277_s23] sm:$0xff] %v410_v40  ;;  %510 = vmatmul.f32.vlgmr.msra.gmra.mxu1 %v410_v40 }
  0xaf   : > { %v413_v41 = vpop.f32.mrf.mxu0 }
  0xb0   : > { %459 = vst [vmem:[%s1277_s23 + $0x8] sm:$0xff] %v413_v41  ;;  %513 = vmatmul.f32.gmra.mxu1 %v413_v41 }
  0xb7   : > { %v416_v42 = vpop.f32.mrf.mxu0 }
  0xb8   : > { %460 = vst [vmem:[%s1277_s23 + $0x10] sm:$0xff] %v416_v42  ;;  %516 = vmatmul.f32.gmra.mxu1 %v416_v42 }
  0xbf   : > { %v419_v43 = vpop.f32.mrf.mxu0 }
  0xc0   : > { %461 = vst [vmem:[%s1277_s23 + $0x18] sm:$0xff] %v419_v43  ;;  %519 = vmatmul.f32.gmra.mxu1 %v419_v43 }
  0xc7   : > { %v422_v44 = vpop.f32.mrf.mxu0 }
  0xc8   : > { %462 = vst [vmem:[%s1277_s23 + $0x20] sm:$0xff] %v422_v44  ;;  %522 = vmatmul.f32.gmra.mxu1 %v422_v44 }
  0xcf   : > { %v425_v45 = vpop.f32.mrf.mxu0 }
  0xd0   : > { %463 = vst [vmem:[%s1277_s23 + $0x28] sm:$0xff] %v425_v45  ;;  %525 = vmatmul.f32.gmra.mxu1 %v425_v45 }
  0xd7   : > { %v428_v46 = vpop.f32.mrf.mxu0 }
  0xd8   : > { %464 = vst [vmem:[%s1277_s23 + $0x30] sm:$0xff] %v428_v46  ;;  %528 = vmatmul.f32.gmra.mxu1 %v428_v46 }
  0xdf   : > { %v431_v47 = vpop.f32.mrf.mxu0 }
  0xe0   : > { %465 = vst [vmem:[%s1277_s23 + $0x38] sm:$0xff] %v431_v47  ;;  %531 = vmatmul.f32.gmra.mxu1 %v431_v47 }
  0xe7   : > { %v434_v48 = vpop.f32.mrf.mxu0 }
  0xe8   : > { %466 = vst [vmem:[%s1277_s23 + $0x40] sm:$0xff] %v434_v48  ;;  %534 = vmatmul.f32.gmra.mxu1 %v434_v48 }
  0xef   : > { %v437_v52 = vpop.f32.mrf.mxu0 }
  0xf0   : > { %467 = vst [vmem:[%s1277_s23 + $0x48] sm:$0xff] %v437_v52  ;;  %537 = vmatmul.f32.gmra.mxu1 %v437_v52 }
  0xf7   : > { %v440_v57 = vpop.f32.mrf.mxu0 }
  0xf8   : > { %468 = vst [vmem:[%s1277_s23 + $0x50] sm:$0xff] %v440_v57  ;;  %540 = vmatmul.f32.gmra.mxu1 %v440_v57  ;;  %v944_v57 = vld [vmem:[%s1481_s5] ss:$0 sm:$0xff] }
  0xff   : > { %v443_v62 = vpop.f32.mrf.mxu0 }
 0x100   : > { %469 = vst [vmem:[%s1277_s23 + $0x58] sm:$0xff] %v443_v62  ;;  %543 = vmatmul.f32.gmra.mxu1 %v443_v62 }
 0x107   : > { %v446_v3 = vpop.f32.mrf.mxu0 }
 0x108   : > { %470 = vst [vmem:[%s1277_s23 + $0x60] sm:$0xff] %v446_v3  ;;  %546 = vmatmul.f32.vlgmr.msra.gmra.mxu3 %v446_v3 }
 0x10f   : > { %v449_v5 = vpop.f32.mrf.mxu0 }
 0x110   : > { %471 = vst [vmem:[%s1277_s23 + $0x68] sm:$0xff] %v449_v5  ;;  %549 = vmatmul.f32.gmra.mxu3 %v449_v5 }
 0x117   : > { %v452_v6 = vpop.f32.mrf.mxu0 }
 0x118   : > { %472 = vst [vmem:[%s1277_s23 + $0x70] sm:$0xff] %v452_v6  ;;  %552 = vmatmul.f32.gmra.mxu3 %v452_v6 }
 0x11f   : > { %v455_v7 = vpop.f32.mrf.mxu0 }
 0x120   : > { %473 = vst [vmem:[%s1277_s23 + $0x78] sm:$0xff] %v455_v7  ;;  %555 = vmatmul.f32.gmra.mxu3 %v455_v7 }
 0x125   : > { %v511_v9 = vpop.f32.mrf.mxu1 }
 0x126   : > { %v512_v10 = vadd.f32 %v943_v8, %v511_v9 }
 0x128   : > { %v559_v11 = vmax.f32 %v512_v10, 0.0 }
 0x12a   : > { %611 = vmatmul.f32.vlgmr.msra.gmra.mxu2 %v559_v11 }
 0x12d   : > { %v514_v12 = vpop.f32.mrf.mxu1 }
 0x12e   : > { %v515_v13 = vadd.f32 %v943_v8, %v514_v12 }
 0x130   : > { %v560_v14 = vmax.f32 %v515_v13, 0.0 }
 0x132   : > { %614 = vmatmul.f32.gmra.mxu2 %v560_v14 }
 0x135   : > { %v517_v15 = vpop.f32.mrf.mxu1 }
 0x136   : > { %v518_v16 = vadd.f32 %v943_v8, %v517_v15 }
 0x138   : > { %v561_v17 = vmax.f32 %v518_v16, 0.0 }
 0x13a   : > { %617 = vmatmul.f32.gmra.mxu2 %v561_v17 }
 0x13d   : > { %v520_v18 = vpop.f32.mrf.mxu1 }
 0x13e   : > { %v521_v19 = vadd.f32 %v943_v8, %v520_v18 }
 0x140   : > { %v562_v20 = vmax.f32 %v521_v19, 0.0 }
 0x142   : > { %620 = vmatmul.f32.gmra.mxu2 %v562_v20 }
 0x145   : > { %v523_v21 = vpop.f32.mrf.mxu1 }
 0x146   : > { %v524_v22 = vadd.f32 %v943_v8, %v523_v21 }
 0x148   : > { %v563_v23 = vmax.f32 %v524_v22, 0.0 }
 0x14a   : > { %623 = vmatmul.f32.gmra.mxu2 %v563_v23 }
 0x14d   : > { %v526_v24 = vpop.f32.mrf.mxu1 }
 0x14e   : > { %v527_v25 = vadd.f32 %v943_v8, %v526_v24 }
 0x150   : > { %v564_v26 = vmax.f32 %v527_v25, 0.0 }
 0x152   : > { %626 = vmatmul.f32.gmra.mxu2 %v564_v26 }
 0x155   : > { %v529_v27 = vpop.f32.mrf.mxu1 }
 0x156   : > { %v530_v28 = vadd.f32 %v943_v8, %v529_v27 }
 0x158   : > { %v565_v29 = vmax.f32 %v530_v28, 0.0 }
 0x15a   : > { %629 = vmatmul.f32.gmra.mxu2 %v565_v29 }
 0x15d   : > { %v532_v30 = vpop.f32.mrf.mxu1 }
 0x15e   : > { %v533_v31 = vadd.f32 %v943_v8, %v532_v30 }
 0x160   : > { %v566_v32 = vmax.f32 %v533_v31, 0.0 }
 0x162   : > { %632 = vmatmul.f32.gmra.mxu2 %v566_v32 }
 0x165   : > { %v535_v33 = vpop.f32.mrf.mxu1 }
 0x166   : > { %v536_v34 = vadd.f32 %v943_v8, %v535_v33 }
 0x168   : > { %v567_v35 = vmax.f32 %v536_v34, 0.0 }
 0x16a   : > { %635 = vmatmul.f32.gmra.mxu2 %v567_v35 }
 0x16d   : > { %v538_v36 = vpop.f32.mrf.mxu1 }
 0x16e   : > { %v539_v37 = vadd.f32 %v943_v8, %v538_v36 }
 0x170   : > { %v568_v38 = vmax.f32 %v539_v37, 0.0 }
 0x172   : > { %638 = vmatmul.f32.gmra.mxu2 %v568_v38 }
 0x175   : > { %v541_v39 = vpop.f32.mrf.mxu1 }
 0x176   : > { %v542_v40 = vadd.f32 %v943_v8, %v541_v39 }
 0x178   : > { %v569_v41 = vmax.f32 %v542_v40, 0.0 }
 0x17a   : > { %641 = vmatmul.f32.gmra.mxu2 %v569_v41 }
 0x17d   : > { %v544_v42 = vpop.f32.mrf.mxu1 }
 0x17e   : > { %v545_v43 = vadd.f32 %v943_v8, %v544_v42 }
 0x180   : > { %v570_v44 = vmax.f32 %v545_v43, 0.0 }
 0x182   : > { %644 = vmatmul.f32.gmra.mxu2 %v570_v44 }
 0x18b   : > { %v547_v45 = vpop.f32.mrf.mxu3 }
 0x18c   : > { %v548_v46 = vadd.f32 %v943_v8, %v547_v45 }
 0x18e   : > { %v571_v47 = vmax.f32 %v548_v46, 0.0 }
 0x190   : > { %647 = vmatmul.f32.vlgmr.msrb.gmra.mxu3 %v571_v47 }
 0x193   : > { %v550_v48 = vpop.f32.mrf.mxu3 }
 0x194   : > { %v551_v49 = vadd.f32 %v943_v8, %v550_v48 }
 0x196   : > { %v572_v50 = vmax.f32 %v551_v49, 0.0 }
 0x198   : > { %650 = vmatmul.f32.gmra.mxu3 %v572_v50 }
 0x19b   : > { %v553_v51 = vpop.f32.mrf.mxu3 }
 0x19c   : > { %v554_v52 = vadd.f32 %v943_v8, %v553_v51 }
 0x19e   : > { %v573_v53 = vmax.f32 %v554_v52, 0.0 }
 0x1a0   : > { %653 = vmatmul.f32.gmra.mxu3 %v573_v53 }
 0x1a3   : > { %v556_v54 = vpop.f32.mrf.mxu3 }
 0x1a4   : > { %v557_v55 = vadd.f32 %v943_v8, %v556_v54 }
 0x1a6   : > { %v574_v56 = vmax.f32 %v557_v55, 0.0 }
 0x1a8   : > { %656 = vmatmul.f32.gmra.mxu3 %v574_v56 }
 0x1ad   : > { %v612_v58 = vpop.f32.mrf.mxu2 }
 0x1ae   : > { %v613_v59 = vadd.f32 %v944_v57, %v612_v58 }
 0x1b0   : > { %660 = vst [vmem:[%s1351_s15] sm:$0xff] %v613_v59 }
 0x1b5   : > { %v615_v60 = vpop.f32.mrf.mxu2 }
 0x1b6   : > { %v616_v61 = vadd.f32 %v944_v57, %v615_v60 }
 0x1b8   : > { %661 = vst [vmem:[%s1351_s15 + $0x8] sm:$0xff] %v616_v61 }
 0x1bd   : > { %v618_v62 = vpop.f32.mrf.mxu2 }
 0x1be   : > { %v619_v63 = vadd.f32 %v944_v57, %v618_v62 }
 0x1c0   : > { %662 = vst [vmem:[%s1351_s15 + $0x10] sm:$0xff] %v619_v63 }
 0x1c5   : > { %v621_v0 = vpop.f32.mrf.mxu2 }
 0x1c6   : > { %v622_v1 = vadd.f32 %v944_v57, %v621_v0 }
 0x1c8   : > { %663 = vst [vmem:[%s1351_s15 + $0x18] sm:$0xff] %v622_v1 }
 0x1cd   : > { %v624_v2 = vpop.f32.mrf.mxu2 }
 0x1ce   : > { %v625_v3 = vadd.f32 %v944_v57, %v624_v2 }
 0x1d0   : > { %664 = vst [vmem:[%s1351_s15 + $0x20] sm:$0xff] %v625_v3 }
 0x1d5   : > { %v627_v4 = vpop.f32.mrf.mxu2 }
 0x1d6   : > { %v628_v5 = vadd.f32 %v944_v57, %v627_v4 }
 0x1d8   : > { %665 = vst [vmem:[%s1351_s15 + $0x28] sm:$0xff] %v628_v5 }
 0x1dd   : > { %v630_v6 = vpop.f32.mrf.mxu2 }
 0x1de   : > { %v631_v7 = vadd.f32 %v944_v57, %v630_v6 }
 0x1e0   : > { %666 = vst [vmem:[%s1351_s15 + $0x30] sm:$0xff] %v631_v7 }
 0x1e5   : > { %v633_v8 = vpop.f32.mrf.mxu2 }
 0x1e6   : > { %v634_v9 = vadd.f32 %v944_v57, %v633_v8 }
 0x1e8   : > { %667 = vst [vmem:[%s1351_s15 + $0x38] sm:$0xff] %v634_v9 }
 0x1ed   : > { %v636_v10 = vpop.f32.mrf.mxu2 }
 0x1ee   : > { %v637_v11 = vadd.f32 %v944_v57, %v636_v10 }
 0x1f0   : > { %668 = vst [vmem:[%s1351_s15 + $0x40] sm:$0xff] %v637_v11 }
 0x1f5   : > { %v639_v12 = vpop.f32.mrf.mxu2 }
 0x1f6   : > { %v640_v13 = vadd.f32 %v944_v57, %v639_v12 }
 0x1f8   : > { %669 = vst [vmem:[%s1351_s15 + $0x48] sm:$0xff] %v640_v13 }
 0x1fd   : > { %v642_v14 = vpop.f32.mrf.mxu2 }
 0x1fe   : > { %v643_v15 = vadd.f32 %v944_v57, %v642_v14 }
 0x200   : > { %670 = vst [vmem:[%s1351_s15 + $0x50] sm:$0xff] %v643_v15 }
 0x205   : > { %v645_v16 = vpop.f32.mrf.mxu2 }
 0x206   : > { %v646_v17 = vadd.f32 %v944_v57, %v645_v16 }
 0x208   : > { %671 = vst [vmem:[%s1351_s15 + $0x58] sm:$0xff] %v646_v17 }
 0x213   : > { %v648_v18 = vpop.f32.mrf.mxu3 }
 0x214   : > { %v649_v19 = vadd.f32 %v944_v57, %v648_v18 }
 0x216   : > { %672 = vst [vmem:[%s1351_s15 + $0x60] sm:$0xff] %v649_v19 }
 0x21b   : > { %v651_v20 = vpop.f32.mrf.mxu3 }
 0x21c   : > { %v652_v21 = vadd.f32 %v944_v57, %v651_v20 }
 0x21e   : > { %673 = vst [vmem:[%s1351_s15 + $0x68] sm:$0xff] %v652_v21 }
 0x223   : > { %v654_v22 = vpop.f32.mrf.mxu3 }
 0x224   : > { %v655_v23 = vadd.f32 %v944_v57, %v654_v22 }
 0x226   : > { %674 = vst [vmem:[%s1351_s15 + $0x70] sm:$0xff] %v655_v23 }
 0x22a   : > { %688 = sbr.rel (!%p1147_p5) target bundleno = 591 (0x24f), region = 48 }
 0x22b   : > { %v657_v24 = vpop.f32.mrf.mxu3 }
 0x22c   : > { %v658_v25 = vadd.f32 %v944_v57, %v657_v24 }
 0x22e   : > { %675 = vst [vmem:[%s1351_s15 + $0x78] sm:$0xff] %v658_v25 }
 0x22f   : > { %s1507_s18 = smov (!%p691_p11, %s690_s18), 16 }
 0x230   : > { %s850_s20 = sshll.u32 %s1507_s18, 3 }
 0x231   : > { %s694_s19 = ssub.s32 128, %s850_s20 }
 0x232   : > { %s695_s29 = sshll.u32 %s694_s19, 4 }
 0x233   : > { %696 = vsyncadd %s1484_s21, %s695_s29  ;;  %p1379_p12 = scmp.ne.s32.totalorder %s850_s20, 0  ;;  %s863_s9 = sshll.u32 %s1130_s28, 7 }
 0x234   : > { %s699_s16 = scalar_lea.hbm %s1482_s6, %s863_s9  ;;  %s701_s0 = sshll.u32 %s1277_s23, 4  ;;  %s1388_s0 = int_to_ptr.vmem [resolvable:$true] %s701_s0 }
 0x235   : > { %s703_s19 = sshll.u32 %s699_s16, 4  ;;  %s1485_s29 = sshll.u32 %s1507_s18, 7  ;;  %s1390_s19 = int_to_ptr.hbm [resolvable:$true] %s703_s19 }
 0x236   : > { %s945_s21 = sshra.s32 %s1388_s0, 4  ;;  %s947_s20 = sshrl.u32 %s1485_s29, 4  ;;  %s946_s21 = int_to_ptr.vmem [resolvable:$true] %s945_s21 }
 0x237   : > { %s952_s1 = scalar_lea.vmem %s946_s21, %s947_s20  ;;  %s1063_s2 = smov [#allocation2]  }
 0x238   : > { %p953_p13 = scmp.ne.s32.totalorder %s946_s21, %s952_s1  ;;  %s956_s13 = scalar_lea.vmem %s1063_s2, 256 }
 0x239   : > { %p958_p2 = scmp.lt.s32.totalorder %s956_s13, %s952_s1 }
 0x23a   : > { %p954_p0 = pnand %p953_p13, %p1379_p12 }
 0x23c   : > { %p955_p1 = pneg %p954_p0 }
 0x23e   : > { %p960_p3 = pnand %p958_p2, %p955_p1 }
 0x240   : > { %963 = shalt.err (!%p960_p3)
}
 0x241   : > { %s964_s23 = sshra.s32 %s1390_s19, 4  ;;  %s975_s21 = scalar_lea.hbm %s1482_s6, 200  ;;  %s965_s23 = int_to_ptr.hbm [resolvable:$true] %s964_s23 }
 0x242   : > { %s971_s16 = scalar_lea.hbm %s965_s23, %s947_s20  ;;  %p976_p9 = scmp.lt.s32.totalorder %s965_s23, %s1482_s6 }
 0x243   : > { %p972_p4 = scmp.ne.s32.totalorder %s965_s23, %s971_s16  ;;  %p977_p10 = scmp.lt.s32.totalorder %s975_s21, %s971_s16 }
 0x245   : > { %p973_p7 = pnand %p972_p4, %p1379_p12  ;;  %p978_p11 = por %p977_p10, %p976_p9 }
 0x247   : > { %p974_p8 = pneg %p973_p7 }
 0x249   : > { %p979_p13 = pnand %p978_p11, %p974_p8 }
 0x24b   : > { %982 = shalt.err (!%p979_p13)
}
 0x24c   : > { %s1064_s1 = smov 128   ;;  %s1065_s2 = smov 8  }
 0x24d   : > { %s1497_s20 = scalar_lea.sflag [#allocation3], %s1193_s22  ;;  %s1498_s13 = sshll.u32 %s1507_s18, 7 }
 0x24e   : > { %709 = dma.vmem_to_hbm [thread:$0]  (%p1379_p12), %s1388_s0, %s1498_s13, %s1390_s19, %s1497_s20, %s1064_s1, %s1064_s1, %s1065_s2  }
 0x24f PF: > { %712 = sbr.rel (!%p1147_p5) target bundleno = 628 (0x274), region = 52  ;;  %s714_s3 = ssub.s32 (%p1147_p5), 25, %s1164_s17 }
 0x250   : > { %p715_p0 = scmp.lt.s32.totalorder (%p1147_p5), %s714_s3, 16  ;;  %s1499_s9 = scalar_lea.sflag (%p1147_p5), [#allocation5], %s1193_s22 }
 0x254   : > { %s1509_s3 = smov (!%p715_p0, %s714_s3), 16 }
 0x255   : > { %s856_s29 = sshll.u32 %s1509_s3, 3 }
 0x256   : > { %s718_s23 = ssub.s32 128, %s856_s29 }
 0x257   : > { %s719_s16 = sshll.u32 %s718_s23, 4 }
 0x258   : > { %720 = vsyncadd %s1499_s9, %s719_s16  ;;  %p1423_p12 = scmp.ne.s32.totalorder %s856_s29, 0  ;;  %s864_s11 = sshll.u32 %s1130_s28, 7 }
 0x259   : > { %s723_s8 = scalar_lea.hbm %s1483_s7, %s864_s11  ;;  %s725_s19 = sshll.u32 %s1351_s15, 4  ;;  %s1432_s19 = int_to_ptr.vmem [resolvable:$true] %s725_s19 }
 0x25a   : > { %s727_s14 = sshll.u32 %s723_s8, 4  ;;  %s860_s21 = sshll.u32 %s1509_s3, 7  ;;  %s1434_s14 = int_to_ptr.hbm [resolvable:$true] %s727_s14 }
 0x25b   : > { %s984_s1 = sshra.s32 %s1432_s19, 4  ;;  %s986_s2 = sshrl.u32 %s860_s21, 4  ;;  %s985_s1 = int_to_ptr.vmem [resolvable:$true] %s984_s1 }
 0x25c   : > { %s991_s20 = scalar_lea.vmem %s985_s1, %s986_s2  ;;  %s1066_s28 = smov [#allocation4]  }
 0x25d   : > { %p992_p5 = scmp.ne.s32.totalorder %s985_s1, %s991_s20  ;;  %s995_s13 = scalar_lea.vmem %s1066_s28, 256 }
 0x25e   : > { %p997_p3 = scmp.lt.s32.totalorder %s995_s13, %s991_s20 }
 0x25f   : > { %p993_p1 = pnand %p992_p5, %p1423_p12 }
 0x261   : > { %p994_p2 = pneg %p993_p1 }
 0x263   : > { %p999_p4 = pnand %p997_p3, %p994_p2 }
 0x265   : > { %1002 = shalt.err (!%p999_p4)
}
 0x266   : > { %s1003_s15 = sshra.s32 %s1434_s14, 4  ;;  %s1014_s9 = scalar_lea.hbm %s1483_s7, 200  ;;  %s1004_s15 = int_to_ptr.hbm [resolvable:$true] %s1003_s15 }
 0x267   : > { %s1010_s29 = scalar_lea.hbm %s1004_s15, %s986_s2  ;;  %p1015_p10 = scmp.lt.s32.totalorder %s1004_s15, %s1483_s7 }
 0x268   : > { %p1011_p7 = scmp.ne.s32.totalorder %s1004_s15, %s1010_s29  ;;  %p1016_p11 = scmp.lt.s32.totalorder %s1014_s9, %s1010_s29 }
 0x26a   : > { %p1012_p8 = pnand %p1011_p7, %p1423_p12  ;;  %p1017_p13 = por %p1016_p11, %p1015_p10 }
 0x26c   : > { %p1013_p9 = pneg %p1012_p8 }
 0x26e   : > { %p1018_p0 = pnand %p1017_p13, %p1013_p9 }
 0x270   : > { %1021 = shalt.err (!%p1018_p0)
}
 0x271   : > { %s1067_s18 = smov 128   ;;  %s1068_s8 = smov 8  }
 0x272   : > { %s1501_s1 = scalar_lea.sflag [#allocation5], %s1193_s22 }
 0x273   : > { %733 = dma.vmem_to_hbm [thread:$0]  (%p1423_p12), %s1432_s19, %s860_s21, %s1434_s14, %s1501_s1, %s1067_s18, %s1067_s18, %s1068_s8  }
 0x274 PF: > { %p906_p5 = scmp.ge.s32.totalorder %s1061_s27, 2  ;;  %s742_s2 = sand.u32 1, %s1049_s24  }
 0x275   : > { %s743_s20 = scalar_lea.sflag [#allocation3], %s742_s2 }
 0x276   : > { %p900_p1 = pnand %p906_p5, %p1151_p6 }
 0x278   : > { %p901_p2 = pneg %p900_p1 }
 0x27a   : > { %1040 = dma.done.wait (%p901_p2), %s743_s20, 2048  }
 0x27b   : > { %1042 = vsyncadd (%p901_p2), %s743_s20, 4294965248  ;;  %s753_s28 = scalar_lea.sflag [#allocation5], %s742_s2 }
 0x27c   : > { %1044 = dma.done.wait (%p901_p2), %s753_s28, 2048  }
 0x27d   : > { %1046 = vsyncadd (%p901_p2), %s753_s28, 4294965248  ;;  %p21_p12 = scmp.ge.s32.totalorder %s1134_s30, 4   ;;  %s1502_s24 = smov %s1053_s25 }
 0x27e   : > { %s1503_s25 = smov %s1057_s26  ;;  %s1504_s26 = smov %s1145_s10 }
 0x27f   : > { %s1505_s27 = smov %s1134_s30  ;;  %23 = sbr.rel (!%p21_p12) target bundleno = 10 (0xa), region = 96 }
 0x284   :  { %759 = vsyncpa [#allocation3], 1 }
 0x285   :  { %761 = vsyncpa [#allocation3 + $0x1], 1 }
 0x286   :  { %762 = vsyncpa [#allocation5], 1 }
 0x287   :  { %764 = vsyncpa [#allocation5 + $0x1], 1 }

// kernel: tpu_custom_call.1
= control target key start
LH: loop header
LB: loop body
LE: loop exit
PB: predicated region body
PF: predicated region fallthrough
CT: control target
= control target key end

     0   :  { %s1476_s0 = inlined_call_operand.vmem [shape: f32[200,64], index: 0, kind: input, shape index: {}]   ;;  %s1477_s1 = inlined_call_operand.vmem [shape: f32[64,128], index: 1, kind: input, shape index: {}]   ;;  %s1478_s2 = inlined_call_operand.vmem [shape: f32[128,128], index: 2, kind: input, shape index: {}]   ;;  %s1479_s3 = inlined_call_operand.vmem [shape: f32[1,128], index: 3, kind: input, shape index: {}]   ;;  %s1480_s4 = inlined_call_operand.vmem [shape: f32[128,128], index: 4, kind: input, shape index: {}]   ;;  %s1481_s5 = inlined_call_operand.vmem [shape: f32[1,128], index: 5, kind: input, shape index: {}]   ;;  %s1482_s6 = inlined_call_operand.hbm [shape: f32[200,128], index: 6, kind: output, shape index: {0}]   ;;  %s1483_s7 = inlined_call_operand.hbm [shape: f32[200,128], index: 7, kind: output, shape index: {1}]  }
   0x1   :  { %1486 = sst [smem:[#allocation8_spill]] %s1476_s0 }
   0x2   :  { %1487 = sst [smem:[#allocation9_spill]] %s1477_s1 }
   0x3   :  { %1488 = sst [smem:[#allocation10_spill]] %s1478_s2 }
   0x4   :  { %1489 = sst [smem:[#allocation11_spill]] %s1479_s3 }
   0x5   :  { %13 = vsyncpa [#allocation3], 0 }
   0x6   :  { %15 = vsyncpa [#allocation3 + $0x1], 0 }
   0x7   :  { %16 = vsyncpa [#allocation5], 0 }
   0x8   :  { %18 = vsyncpa [#allocation5 + $0x1], 0  ;;  %s1109_s24 = smov 0   ;;  %s1111_s25 = smov 0  }
   0x9   :  { %s1113_s26 = smov 0   ;;  %s1115_s27 = smov 0  }
   0xa LB: > { %s1130_s28 = sadd.s32 4294967295, %s1061_s27   ;;  %s823_s29 = sadd.s32 4294967294, %s1061_s27   ;;  %s1061_s27 = sphi %s1115_s27, %s1505_s27   ;;  %s1057_s26 = sphi %s1113_s26, %s1504_s26   ;;  %s1053_s25 = sphi %s1111_s25, %s1503_s25   ;;  %s1049_s24 = sphi %s1109_s24, %s1502_s24  }
   0xb   : > { %s1134_s30 = sadd.s32 1, %s1061_s27   ;;  %s162_s8 = sadd.s32 1, %s1057_s26 }
   0xc   : > { %s159_s9 = ssub.s32 %s1061_s27, %s1134_s30  ;;  %p172_p0 = scmp.ne.s32.totalorder %s1057_s26, %s1053_s25 }
   0xd   : > { %p160_p1 = scmp.eq.s32.totalorder %s159_s9, 0  ;;  %p173_p2 = scmp.eq.s32.totalorder %s1130_s28, 1 }
   0xe   : > { %p178_p3 = scmp.ne.s32.totalorder %s1053_s25, %s1049_s24  ;;  %p179_p4 = scmp.eq.s32.totalorder %s823_s29, 1 }
   0xf   : > { %s1145_s10 = scalar_select %p160_p1, %s1057_s26, %s162_s8  }
  0x10   : > { %p1147_p5 = por %p173_p2, %p172_p0  ;;  %p1151_p6 = por %p179_p4, %p178_p3 }
  0x11   : > { %p826_p7 = scmp.ge.s32.totalorder %s1061_s27, 1  ;;  %p255_p8 = scmp.lt.s32.totalorder %s1061_s27, 3 }
  0x13   : > { %p256_p9 = pnand %p826_p7, %p255_p8 }
  0x14   : > { %s1492_s1 = sld [smem:[#allocation9_spill]] (!%p256_p9)  ;;  %s1164_s17 = sshll.u32 (!%p256_p9), %s1130_s28, 4 }
  0x15   : > { %259 = sbr.rel (%p256_p9) target bundleno = 628 (0x274), region = 44  ;;  %p301_p10 = scmp.lt.s32.totalorder (!%p256_p9), %s1164_s17, 24 }
  0x16   : > { %s1493_s0 = sld [smem:[#allocation8_spill]] (!%p256_p9)  ;;  %s1193_s22 = sand.u32 (!%p256_p9), 1, %s1053_s25  }
  0x17   : > { %s1494_s2 = sld [smem:[#allocation10_spill]] (!%p256_p9)  ;;  %s827_s21 = sshll.u32 (!%p256_p9), %s1193_s22, 7 }
  0x18   : > { %s1277_s23 = scalar_lea.vmem (!%p256_p9), [#allocation2], %s827_s21  ;;  %s1495_s3 = sld [smem:[#allocation11_spill]] (!%p256_p9) }
  0x19   : > { %s1351_s15 = scalar_lea.vmem (!%p256_p9), [#allocation4], %s827_s21  ;;  %s1484_s21 = scalar_lea.sflag (!%p256_p9), [#allocation3], %s1193_s22 }
  0x1a   : > { %v343_v0 = vld [vmem:[%s1492_s1 + $0x38] sm:$0xff]  ;;  %v342_v1 = vld [vmem:[%s1492_s1 + $0x30] sm:$0xff]  ;;  %v341_v2 = vld [vmem:[%s1492_s1 + $0x28] sm:$0xff]  ;;  %s302_s20 = scalar_select %p301_p10, %s1164_s17, 24  ;;  %vm344_vm0 = vcmask 523264  }
  0x1b   : > { %401 = vmatpush.msra.mxu0 %v343_v0  ;;  %v340_v3 = vld [vmem:[%s1492_s1 + $0x20] sm:$0xff]  ;;  %v339_v4 = vld [vmem:[%s1492_s1 + $0x18] sm:$0xff]  ;;  %v338_v5 = vld [vmem:[%s1492_s1 + $0x10] sm:$0xff]  ;;  %s690_s18 = ssub.s32 (%p1147_p5), 25, %s1164_s17 }
  0x1c   : > { %s830_s8 = sshll.u32 %s302_s20, 3  ;;  %v337_v6 = vld [vmem:[%s1492_s1 + $0x8] sm:$0xff]  ;;  %v336_v7 = vld [vmem:[%s1492_s1] sm:$0xff]  ;;  %v590_v49 = vld [vmem:[%s1480_s4 + $0x78] sm:$0xff]  ;;  %p691_p11 = scmp.lt.s32.totalorder (%p1147_p5), %s690_s18, 16 }
  0x1d   : > { %402 = vmatpush.msra.mxu0 %v342_v1  ;;  %s1186_s19 = scalar_lea.vmem %s1493_s0, %s830_s8  ;;  %v489_v16 = vld [vmem:[%s1494_s2 + $0x78] sm:$0xff]  ;;  %v488_v18 = vld [vmem:[%s1494_s2 + $0x70] sm:$0xff]  ;;  %v487_v19 = vld [vmem:[%s1494_s2 + $0x68] sm:$0xff]  ;;  %595 = vmatpush.msra.mxu2 %v590_v49 }
  0x1e   : > { %v320_v8 = vld [vmem:[%s1186_s19] sm:$0xff]  ;;  %v321_v9 = vld [vmem:[%s1186_s19 + $0x8] sm:$0xff]  ;;  %v322_v10 = vld [vmem:[%s1186_s19 + $0x10] sm:$0xff]  ;;  %494 = vmatpush.msra.mxu1 %v489_v16  ;;  %865 = vmatpush.msra.mxu3 %v489_v16 }
  0x1f   : > { %403 = vmatpush.msra.mxu0 %v341_v2  ;;  %v323_v11 = vld [vmem:[%s1186_s19 + $0x18] sm:$0xff]  ;;  %v324_v12 = vld [vmem:[%s1186_s19 + $0x20] sm:$0xff]  ;;  %v325_v13 = vld [vmem:[%s1186_s19 + $0x28] sm:$0xff] }
  0x20   : > { %v326_v14 = vld [vmem:[%s1186_s19 + $0x30] sm:$0xff]  ;;  %v327_v15 = vld [vmem:[%s1186_s19 + $0x38] sm:$0xff]  ;;  %v328_v17 = vld [vmem:[%s1186_s19 + $0x40] sm:$0xff]  ;;  %495 = vmatpush.msra.mxu1 %v488_v18  ;;  %866 = vmatpush.msra.mxu3 %v488_v18 }
  0x21   : > { %404 = vmatpush.msra.mxu0 %v340_v3  ;;  %v486_v20 = vld [vmem:[%s1494_s2 + $0x60] sm:$0xff]  ;;  %v485_v21 = vld [vmem:[%s1494_s2 + $0x58] sm:$0xff]  ;;  %v329_v22 = vld [vmem:[%s1186_s19 + $0x48] sm:$0xff] }
  0x22   : > { %496 = vmatpush.msra.mxu1 %v487_v19  ;;  %867 = vmatpush.msra.mxu3 %v487_v19  ;;  %v484_v23 = vld [vmem:[%s1494_s2 + $0x50] sm:$0xff]  ;;  %v483_v24 = vld [vmem:[%s1494_s2 + $0x48] sm:$0xff]  ;;  %v482_v25 = vld [vmem:[%s1494_s2 + $0x40] sm:$0xff] }
  0x23   : > { %405 = vmatpush.msra.mxu0 %v339_v4  ;;  %v481_v26 = vld [vmem:[%s1494_s2 + $0x38] sm:$0xff]  ;;  %v330_v27 = vld [vmem:[%s1186_s19 + $0x50] sm:$0xff]  ;;  %v479_v29 = vld [vmem:[%s1494_s2 + $0x28] sm:$0xff] }
  0x24   : > { %497 = vmatpush.msra.mxu1 %v486_v20  ;;  %868 = vmatpush.msra.mxu3 %v486_v20  ;;  %v480_v28 = vld [vmem:[%s1494_s2 + $0x30] sm:$0xff]  ;;  %v478_v30 = vld [vmem:[%s1494_s2 + $0x20] sm:$0xff]  ;;  %v477_v31 = vld [vmem:[%s1494_s2 + $0x18] sm:$0xff] }
  0x25   : > { %406 = vmatpush.msra.mxu0 %v338_v5  ;;  %v331_v32 = vld [vmem:[%s1186_s19 + $0x58] sm:$0xff]  ;;  %v476_v33 = vld [vmem:[%s1494_s2 + $0x10] sm:$0xff]  ;;  %v475_v34 = vld [vmem:[%s1494_s2 + $0x8] sm:$0xff] }
  0x26   : > { %498 = vmatpush.msra.mxu1 %v485_v21  ;;  %869 = vmatpush.msra.mxu3 %v485_v21  ;;  %v474_v35 = vld [vmem:[%s1494_s2] sm:$0xff]  ;;  %v333_v37 = vld [vmem:[%s1186_s19 + $0x68] sm:$0xff]  ;;  %v334_v38 = vld [vmem:[%s1186_s19 + $0x70] sm:$0xff] }
  0x27   : > { %407 = vmatpush.msra.mxu0 %v337_v6  ;;  %v332_v36 = vld [vmem:[%s1186_s19 + $0x60] sm:$0xff]  ;;  %v335_v39 = vld [vmem:[%s1186_s19 + $0x78] sm:$0xff]  ;;  %v589_v50 = vld [vmem:[%s1480_s4 + $0x70] sm:$0xff] }
  0x28   : > { %499 = vmatpush.msra.mxu1 %v484_v23  ;;  %870 = vmatpush.msra.mxu3 %v484_v23  ;;  %v588_v51 = vld [vmem:[%s1480_s4 + $0x68] sm:$0xff]  ;;  %v587_v53 = vld [vmem:[%s1480_s4 + $0x60] sm:$0xff]  ;;  %v586_v54 = vld [vmem:[%s1480_s4 + $0x58] sm:$0xff] }
  0x29   : > { %408 = vmatpush.msra.mxu0 %v336_v7  ;;  %596 = vmatpush.msra.mxu2 %v589_v50  ;;  %v585_v55 = vld [vmem:[%s1480_s4 + $0x50] sm:$0xff]  ;;  %v584_v56 = vld [vmem:[%s1480_s4 + $0x48] sm:$0xff]  ;;  %v583_v58 = vld [vmem:[%s1480_s4 + $0x40] sm:$0xff] }
  0x2a   : > { %831 = vmatmul.msk.f32.vlgmr.msra.gmra.mxu0 %vm344_vm0, %v320_v8  ;;  %500 = vmatpush.msra.mxu1 %v483_v24  ;;  %v582_v59 = vld [vmem:[%s1480_s4 + $0x38] sm:$0xff]  ;;  %v581_v60 = vld [vmem:[%s1480_s4 + $0x30] sm:$0xff]  ;;  %v580_v61 = vld [vmem:[%s1480_s4 + $0x28] sm:$0xff] }
  0x2b   : > { %871 = vmatpush.msra.mxu3 %v483_v24  ;;  %597 = vmatpush.msra.mxu2 %v588_v51  ;;  %v579_v63 = vld [vmem:[%s1480_s4 + $0x20] sm:$0xff]  ;;  %v578_v0 = vld [vmem:[%s1480_s4 + $0x18] sm:$0xff]  ;;  %v577_v1 = vld [vmem:[%s1480_s4 + $0x10] sm:$0xff] }
  0x2c   : > { %501 = vmatpush.msra.mxu1 %v482_v25  ;;  %v576_v2 = vld [vmem:[%s1480_s4 + $0x8] sm:$0xff]  ;;  %v575_v4 = vld [vmem:[%s1480_s4] sm:$0xff] }
  0x2d   : > { %872 = vmatpush.msra.mxu3 %v482_v25  ;;  %598 = vmatpush.msra.mxu2 %v587_v53  ;;  %v943_v8 = vld [vmem:[%s1495_s3] ss:$0 sm:$0xff] }
  0x2e   : > { %502 = vmatpush.msra.mxu1 %v481_v26 }
  0x2f   : > { %873 = vmatpush.msra.mxu3 %v481_v26  ;;  %599 = vmatpush.msra.mxu2 %v586_v54 }
  0x30   : > { %503 = vmatpush.msra.mxu1 %v480_v28 }
  0x31   : > { %874 = vmatpush.msra.mxu3 %v480_v28  ;;  %600 = vmatpush.msra.mxu2 %v585_v55 }
  0x32   : > { %832 = vmatmul.msk.f32.gmra.mxu0 %vm344_vm0, %v321_v9  ;;  %504 = vmatpush.msra.mxu1 %v479_v29 }
  0x33   : > { %875 = vmatpush.msra.mxu3 %v479_v29  ;;  %601 = vmatpush.msra.mxu2 %v584_v56 }
  0x34   : > { %505 = vmatpush.msra.mxu1 %v478_v30 }
  0x35   : > { %876 = vmatpush.msra.mxu3 %v478_v30  ;;  %602 = vmatpush.msra.mxu2 %v583_v58 }
  0x36   : > { %506 = vmatpush.msra.mxu1 %v477_v31 }
  0x37   : > { %877 = vmatpush.msra.mxu3 %v477_v31  ;;  %603 = vmatpush.msra.mxu2 %v582_v59 }
  0x38   : > { %507 = vmatpush.msra.mxu1 %v476_v33 }
  0x39   : > { %878 = vmatpush.msra.mxu3 %v476_v33  ;;  %604 = vmatpush.msra.mxu2 %v581_v60 }
  0x3a   : > { %833 = vmatmul.msk.f32.gmra.mxu0 %vm344_vm0, %v322_v10  ;;  %508 = vmatpush.msra.mxu1 %v475_v34 }
  0x3b   : > { %879 = vmatpush.msra.mxu3 %v475_v34  ;;  %605 = vmatpush.msra.mxu2 %v580_v61 }
  0x3c   : > { %509 = vmatpush.msra.mxu1 %v474_v35 }
  0x3d   : > { %880 = vmatpush.msra.mxu3 %v474_v35  ;;  %606 = vmatpush.msra.mxu2 %v579_v63 }
  0x3f   : > { %881 = vmatpush.msrb.mxu3 %v590_v49  ;;  %607 = vmatpush.msra.mxu2 %v578_v0 }
  0x41   : > { %882 = vmatpush.msrb.mxu3 %v589_v50  ;;  %608 = vmatpush.msra.mxu2 %v577_v1 }
  0x42   : > { %834 = vmatmul.msk.f32.gmra.mxu0 %vm344_vm0, %v323_v11 }
  0x43   : > { %883 = vmatpush.msrb.mxu3 %v588_v51  ;;  %609 = vmatpush.msra.mxu2 %v576_v2 }
  0x45   : > { %884 = vmatpush.msrb.mxu3 %v587_v53  ;;  %610 = vmatpush.msra.mxu2 %v575_v4 }
  0x47   : > { %885 = vmatpush.msrb.mxu3 %v586_v54 }
  0x49   : > { %886 = vmatpush.msrb.mxu3 %v585_v55 }
  0x4a   : > { %835 = vmatmul.msk.f32.gmra.mxu0 %vm344_vm0, %v324_v12 }
  0x4b   : > { %887 = vmatpush.msrb.mxu3 %v584_v56 }
  0x4d   : > { %888 = vmatpush.msrb.mxu3 %v583_v58 }
  0x4f   : > { %889 = vmatpush.msrb.mxu3 %v582_v59 }
  0x51   : > { %890 = vmatpush.msrb.mxu3 %v581_v60 }
  0x52   : > { %836 = vmatmul.msk.f32.gmra.mxu0 %vm344_vm0, %v325_v13 }
  0x53   : > { %891 = vmatpush.msrb.mxu3 %v580_v61 }
  0x55   : > { %892 = vmatpush.msrb.mxu3 %v579_v63 }
  0x57   : > { %893 = vmatpush.msrb.mxu3 %v578_v0 }
  0x59   : > { %894 = vmatpush.msrb.mxu3 %v577_v1 }
  0x5a   : > { %837 = vmatmul.msk.f32.gmra.mxu0 %vm344_vm0, %v326_v14 }
  0x5b   : > { %895 = vmatpush.msrb.mxu3 %v576_v2 }
  0x5d   : > { %896 = vmatpush.msrb.mxu3 %v575_v4 }
  0x62   : > { %838 = vmatmul.msk.f32.gmra.mxu0 %vm344_vm0, %v327_v15 }
  0x6a   : > { %839 = vmatmul.msk.f32.gmra.mxu0 %vm344_vm0, %v328_v17 }
  0x72   : > { %840 = vmatmul.msk.f32.gmra.mxu0 %vm344_vm0, %v329_v22 }
  0x7a   : > { %841 = vmatmul.msk.f32.gmra.mxu0 %vm344_vm0, %v330_v27 }
  0x82   : > { %842 = vmatmul.msk.f32.gmra.mxu0 %vm344_vm0, %v331_v32 }
  0x8a   : > { %843 = vmatmul.msk.f32.gmra.mxu0 %vm344_vm0, %v332_v36 }
  0x92   : > { %844 = vmatmul.msk.f32.gmra.mxu0 %vm344_vm0, %v333_v37 }
  0x9a   : > { %845 = vmatmul.msk.f32.gmra.mxu0 %vm344_vm0, %v334_v38 }
  0xa2   : > { %846 = vmatmul.msk.f32.gmra.mxu0 %vm344_vm0, %v335_v39 }
  0xa7   : > { %v410_v40 = vpop.f32.mrf.mxu0 }
  0xa8   : > { %458 = vst [vmem:[%s1277_s23] sm:$0xff] %v410_v40  ;;  %510 = vmatmul.f32.vlgmr.msra.gmra.mxu1 %v410_v40 }
  0xaf   : > { %v413_v41 = vpop.f32.mrf.mxu0 }
  0xb0   : > { %459 = vst [vmem:[%s1277_s23 + $0x8] sm:$0xff] %v413_v41  ;;  %513 = vmatmul.f32.gmra.mxu1 %v413_v41 }
  0xb7   : > { %v416_v42 = vpop.f32.mrf.mxu0 }
  0xb8   : > { %460 = vst [vmem:[%s1277_s23 + $0x10] sm:$0xff] %v416_v42  ;;  %516 = vmatmul.f32.gmra.mxu1 %v416_v42 }
  0xbf   : > { %v419_v43 = vpop.f32.mrf.mxu0 }
  0xc0   : > { %461 = vst [vmem:[%s1277_s23 + $0x18] sm:$0xff] %v419_v43  ;;  %519 = vmatmul.f32.gmra.mxu1 %v419_v43 }
  0xc7   : > { %v422_v44 = vpop.f32.mrf.mxu0 }
  0xc8   : > { %462 = vst [vmem:[%s1277_s23 + $0x20] sm:$0xff] %v422_v44  ;;  %522 = vmatmul.f32.gmra.mxu1 %v422_v44 }
  0xcf   : > { %v425_v45 = vpop.f32.mrf.mxu0 }
  0xd0   : > { %463 = vst [vmem:[%s1277_s23 + $0x28] sm:$0xff] %v425_v45  ;;  %525 = vmatmul.f32.gmra.mxu1 %v425_v45 }
  0xd7   : > { %v428_v46 = vpop.f32.mrf.mxu0 }
  0xd8   : > { %464 = vst [vmem:[%s1277_s23 + $0x30] sm:$0xff] %v428_v46  ;;  %528 = vmatmul.f32.gmra.mxu1 %v428_v46 }
  0xdf   : > { %v431_v47 = vpop.f32.mrf.mxu0 }
  0xe0   : > { %465 = vst [vmem:[%s1277_s23 + $0x38] sm:$0xff] %v431_v47  ;;  %531 = vmatmul.f32.gmra.mxu1 %v431_v47 }
  0xe7   : > { %v434_v48 = vpop.f32.mrf.mxu0 }
  0xe8   : > { %466 = vst [vmem:[%s1277_s23 + $0x40] sm:$0xff] %v434_v48  ;;  %534 = vmatmul.f32.gmra.mxu1 %v434_v48 }
  0xef   : > { %v437_v52 = vpop.f32.mrf.mxu0 }
  0xf0   : > { %467 = vst [vmem:[%s1277_s23 + $0x48] sm:$0xff] %v437_v52  ;;  %537 = vmatmul.f32.gmra.mxu1 %v437_v52 }
  0xf7   : > { %v440_v57 = vpop.f32.mrf.mxu0 }
  0xf8   : > { %468 = vst [vmem:[%s1277_s23 + $0x50] sm:$0xff] %v440_v57  ;;  %540 = vmatmul.f32.gmra.mxu1 %v440_v57  ;;  %v944_v57 = vld [vmem:[%s1481_s5] ss:$0 sm:$0xff] }
  0xff   : > { %v443_v62 = vpop.f32.mrf.mxu0 }
 0x100   : > { %469 = vst [vmem:[%s1277_s23 + $0x58] sm:$0xff] %v443_v62  ;;  %543 = vmatmul.f32.gmra.mxu1 %v443_v62 }
 0x107   : > { %v446_v3 = vpop.f32.mrf.mxu0 }
 0x108   : > { %470 = vst [vmem:[%s1277_s23 + $0x60] sm:$0xff] %v446_v3  ;;  %546 = vmatmul.f32.vlgmr.msra.gmra.mxu3 %v446_v3 }
 0x10f   : > { %v449_v5 = vpop.f32.mrf.mxu0 }
 0x110   : > { %471 = vst [vmem:[%s1277_s23 + $0x68] sm:$0xff] %v449_v5  ;;  %549 = vmatmul.f32.gmra.mxu3 %v449_v5 }
 0x117   : > { %v452_v6 = vpop.f32.mrf.mxu0 }
 0x118   : > { %472 = vst [vmem:[%s1277_s23 + $0x70] sm:$0xff] %v452_v6  ;;  %552 = vmatmul.f32.gmra.mxu3 %v452_v6 }
 0x11f   : > { %v455_v7 = vpop.f32.mrf.mxu0 }
 0x120   : > { %473 = vst [vmem:[%s1277_s23 + $0x78] sm:$0xff] %v455_v7  ;;  %555 = vmatmul.f32.gmra.mxu3 %v455_v7 }
 0x125   : > { %v511_v9 = vpop.f32.mrf.mxu1 }
 0x126   : > { %v512_v10 = vadd.f32 %v943_v8, %v511_v9 }
 0x128   : > { %v559_v11 = vmax.f32 %v512_v10, 0.0 }
 0x12a   : > { %611 = vmatmul.f32.vlgmr.msra.gmra.mxu2 %v559_v11 }
 0x12d   : > { %v514_v12 = vpop.f32.mrf.mxu1 }
 0x12e   : > { %v515_v13 = vadd.f32 %v943_v8, %v514_v12 }
 0x130   : > { %v560_v14 = vmax.f32 %v515_v13, 0.0 }
 0x132   : > { %614 = vmatmul.f32.gmra.mxu2 %v560_v14 }
 0x135   : > { %v517_v15 = vpop.f32.mrf.mxu1 }
 0x136   : > { %v518_v16 = vadd.f32 %v943_v8, %v517_v15 }
 0x138   : > { %v561_v17 = vmax.f32 %v518_v16, 0.0 }
 0x13a   : > { %617 = vmatmul.f32.gmra.mxu2 %v561_v17 }
 0x13d   : > { %v520_v18 = vpop.f32.mrf.mxu1 }
 0x13e   : > { %v521_v19 = vadd.f32 %v943_v8, %v520_v18 }
 0x140   : > { %v562_v20 = vmax.f32 %v521_v19, 0.0 }
 0x142   : > { %620 = vmatmul.f32.gmra.mxu2 %v562_v20 }
 0x145   : > { %v523_v21 = vpop.f32.mrf.mxu1 }
 0x146   : > { %v524_v22 = vadd.f32 %v943_v8, %v523_v21 }
 0x148   : > { %v563_v23 = vmax.f32 %v524_v22, 0.0 }
 0x14a   : > { %623 = vmatmul.f32.gmra.mxu2 %v563_v23 }
 0x14d   : > { %v526_v24 = vpop.f32.mrf.mxu1 }
 0x14e   : > { %v527_v25 = vadd.f32 %v943_v8, %v526_v24 }
 0x150   : > { %v564_v26 = vmax.f32 %v527_v25, 0.0 }
 0x152   : > { %626 = vmatmul.f32.gmra.mxu2 %v564_v26 }
 0x155   : > { %v529_v27 = vpop.f32.mrf.mxu1 }
 0x156   : > { %v530_v28 = vadd.f32 %v943_v8, %v529_v27 }
 0x158   : > { %v565_v29 = vmax.f32 %v530_v28, 0.0 }
 0x15a   : > { %629 = vmatmul.f32.gmra.mxu2 %v565_v29 }
 0x15d   : > { %v532_v30 = vpop.f32.mrf.mxu1 }
 0x15e   : > { %v533_v31 = vadd.f32 %v943_v8, %v532_v30 }
 0x160   : > { %v566_v32 = vmax.f32 %v533_v31, 0.0 }
 0x162   : > { %632 = vmatmul.f32.gmra.mxu2 %v566_v32 }
 0x165   : > { %v535_v33 = vpop.f32.mrf.mxu1 }
 0x166   : > { %v536_v34 = vadd.f32 %v943_v8, %v535_v33 }
 0x168   : > { %v567_v35 = vmax.f32 %v536_v34, 0.0 }
 0x16a   : > { %635 = vmatmul.f32.gmra.mxu2 %v567_v35 }
 0x16d   : > { %v538_v36 = vpop.f32.mrf.mxu1 }
 0x16e   : > { %v539_v37 = vadd.f32 %v943_v8, %v538_v36 }
 0x170   : > { %v568_v38 = vmax.f32 %v539_v37, 0.0 }
 0x172   : > { %638 = vmatmul.f32.gmra.mxu2 %v568_v38 }
 0x175   : > { %v541_v39 = vpop.f32.mrf.mxu1 }
 0x176   : > { %v542_v40 = vadd.f32 %v943_v8, %v541_v39 }
 0x178   : > { %v569_v41 = vmax.f32 %v542_v40, 0.0 }
 0x17a   : > { %641 = vmatmul.f32.gmra.mxu2 %v569_v41 }
 0x17d   : > { %v544_v42 = vpop.f32.mrf.mxu1 }
 0x17e   : > { %v545_v43 = vadd.f32 %v943_v8, %v544_v42 }
 0x180   : > { %v570_v44 = vmax.f32 %v545_v43, 0.0 }
 0x182   : > { %644 = vmatmul.f32.gmra.mxu2 %v570_v44 }
 0x18b   : > { %v547_v45 = vpop.f32.mrf.mxu3 }
 0x18c   : > { %v548_v46 = vadd.f32 %v943_v8, %v547_v45 }
 0x18e   : > { %v571_v47 = vmax.f32 %v548_v46, 0.0 }
 0x190   : > { %647 = vmatmul.f32.vlgmr.msrb.gmra.mxu3 %v571_v47 }
 0x193   : > { %v550_v48 = vpop.f32.mrf.mxu3 }
 0x194   : > { %v551_v49 = vadd.f32 %v943_v8, %v550_v48 }
 0x196   : > { %v572_v50 = vmax.f32 %v551_v49, 0.0 }
 0x198   : > { %650 = vmatmul.f32.gmra.mxu3 %v572_v50 }
 0x19b   : > { %v553_v51 = vpop.f32.mrf.mxu3 }
 0x19c   : > { %v554_v52 = vadd.f32 %v943_v8, %v553_v51 }
 0x19e   : > { %v573_v53 = vmax.f32 %v554_v52, 0.0 }
 0x1a0   : > { %653 = vmatmul.f32.gmra.mxu3 %v573_v53 }
 0x1a3   : > { %v556_v54 = vpop.f32.mrf.mxu3 }
 0x1a4   : > { %v557_v55 = vadd.f32 %v943_v8, %v556_v54 }
 0x1a6   : > { %v574_v56 = vmax.f32 %v557_v55, 0.0 }
 0x1a8   : > { %656 = vmatmul.f32.gmra.mxu3 %v574_v56 }
 0x1ad   : > { %v612_v58 = vpop.f32.mrf.mxu2 }
 0x1ae   : > { %v613_v59 = vadd.f32 %v944_v57, %v612_v58 }
 0x1b0   : > { %660 = vst [vmem:[%s1351_s15] sm:$0xff] %v613_v59 }
 0x1b5   : > { %v615_v60 = vpop.f32.mrf.mxu2 }
 0x1b6   : > { %v616_v61 = vadd.f32 %v944_v57, %v615_v60 }
 0x1b8   : > { %661 = vst [vmem:[%s1351_s15 + $0x8] sm:$0xff] %v616_v61 }
 0x1bd   : > { %v618_v62 = vpop.f32.mrf.mxu2 }
 0x1be   : > { %v619_v63 = vadd.f32 %v944_v57, %v618_v62 }
 0x1c0   : > { %662 = vst [vmem:[%s1351_s15 + $0x10] sm:$0xff] %v619_v63 }
 0x1c5   : > { %v621_v0 = vpop.f32.mrf.mxu2 }
 0x1c6   : > { %v622_v1 = vadd.f32 %v944_v57, %v621_v0 }
 0x1c8   : > { %663 = vst [vmem:[%s1351_s15 + $0x18] sm:$0xff] %v622_v1 }
 0x1cd   : > { %v624_v2 = vpop.f32.mrf.mxu2 }
 0x1ce   : > { %v625_v3 = vadd.f32 %v944_v57, %v624_v2 }
 0x1d0   : > { %664 = vst [vmem:[%s1351_s15 + $0x20] sm:$0xff] %v625_v3 }
 0x1d5   : > { %v627_v4 = vpop.f32.mrf.mxu2 }
 0x1d6   : > { %v628_v5 = vadd.f32 %v944_v57, %v627_v4 }
 0x1d8   : > { %665 = vst [vmem:[%s1351_s15 + $0x28] sm:$0xff] %v628_v5 }
 0x1dd   : > { %v630_v6 = vpop.f32.mrf.mxu2 }
 0x1de   : > { %v631_v7 = vadd.f32 %v944_v57, %v630_v6 }
 0x1e0   : > { %666 = vst [vmem:[%s1351_s15 + $0x30] sm:$0xff] %v631_v7 }
 0x1e5   : > { %v633_v8 = vpop.f32.mrf.mxu2 }
 0x1e6   : > { %v634_v9 = vadd.f32 %v944_v57, %v633_v8 }
 0x1e8   : > { %667 = vst [vmem:[%s1351_s15 + $0x38] sm:$0xff] %v634_v9 }
 0x1ed   : > { %v636_v10 = vpop.f32.mrf.mxu2 }
 0x1ee   : > { %v637_v11 = vadd.f32 %v944_v57, %v636_v10 }
 0x1f0   : > { %668 = vst [vmem:[%s1351_s15 + $0x40] sm:$0xff] %v637_v11 }
 0x1f5   : > { %v639_v12 = vpop.f32.mrf.mxu2 }
 0x1f6   : > { %v640_v13 = vadd.f32 %v944_v57, %v639_v12 }
 0x1f8   : > { %669 = vst [vmem:[%s1351_s15 + $0x48] sm:$0xff] %v640_v13 }
 0x1fd   : > { %v642_v14 = vpop.f32.mrf.mxu2 }
 0x1fe   : > { %v643_v15 = vadd.f32 %v944_v57, %v642_v14 }
 0x200   : > { %670 = vst [vmem:[%s1351_s15 + $0x50] sm:$0xff] %v643_v15 }
 0x205   : > { %v645_v16 = vpop.f32.mrf.mxu2 }
 0x206   : > { %v646_v17 = vadd.f32 %v944_v57, %v645_v16 }
 0x208   : > { %671 = vst [vmem:[%s1351_s15 + $0x58] sm:$0xff] %v646_v17 }
 0x213   : > { %v648_v18 = vpop.f32.mrf.mxu3 }
 0x214   : > { %v649_v19 = vadd.f32 %v944_v57, %v648_v18 }
 0x216   : > { %672 = vst [vmem:[%s1351_s15 + $0x60] sm:$0xff] %v649_v19 }
 0x21b   : > { %v651_v20 = vpop.f32.mrf.mxu3 }
 0x21c   : > { %v652_v21 = vadd.f32 %v944_v57, %v651_v20 }
 0x21e   : > { %673 = vst [vmem:[%s1351_s15 + $0x68] sm:$0xff] %v652_v21 }
 0x223   : > { %v654_v22 = vpop.f32.mrf.mxu3 }
 0x224   : > { %v655_v23 = vadd.f32 %v944_v57, %v654_v22 }
 0x226   : > { %674 = vst [vmem:[%s1351_s15 + $0x70] sm:$0xff] %v655_v23 }
 0x22a   : > { %688 = sbr.rel (!%p1147_p5) target bundleno = 591 (0x24f), region = 48 }
 0x22b   : > { %v657_v24 = vpop.f32.mrf.mxu3 }
 0x22c   : > { %v658_v25 = vadd.f32 %v944_v57, %v657_v24 }
 0x22e   : > { %675 = vst [vmem:[%s1351_s15 + $0x78] sm:$0xff] %v658_v25 }
 0x22f   : > { %s1507_s18 = smov (!%p691_p11, %s690_s18), 16 }
 0x230   : > { %s850_s20 = sshll.u32 %s1507_s18, 3 }
 0x231   : > { %s694_s19 = ssub.s32 128, %s850_s20 }
 0x232   : > { %s695_s29 = sshll.u32 %s694_s19, 4 }
 0x233   : > { %696 = vsyncadd %s1484_s21, %s695_s29  ;;  %p1379_p12 = scmp.ne.s32.totalorder %s850_s20, 0  ;;  %s863_s9 = sshll.u32 %s1130_s28, 7 }
 0x234   : > { %s699_s16 = scalar_lea.hbm %s1482_s6, %s863_s9  ;;  %s701_s0 = sshll.u32 %s1277_s23, 4  ;;  %s1388_s0 = int_to_ptr.vmem [resolvable:$true] %s701_s0 }
 0x235   : > { %s703_s19 = sshll.u32 %s699_s16, 4  ;;  %s1485_s29 = sshll.u32 %s1507_s18, 7  ;;  %s1390_s19 = int_to_ptr.hbm [resolvable:$true] %s703_s19 }
 0x236   : > { %s945_s21 = sshra.s32 %s1388_s0, 4  ;;  %s947_s20 = sshrl.u32 %s1485_s29, 4  ;;  %s946_s21 = int_to_ptr.vmem [resolvable:$true] %s945_s21 }
 0x237   : > { %s952_s1 = scalar_lea.vmem %s946_s21, %s947_s20  ;;  %s1063_s2 = smov [#allocation2]  }
 0x238   : > { %p953_p13 = scmp.ne.s32.totalorder %s946_s21, %s952_s1  ;;  %s956_s13 = scalar_lea.vmem %s1063_s2, 256 }
 0x239   : > { %p958_p2 = scmp.lt.s32.totalorder %s956_s13, %s952_s1 }
 0x23a   : > { %p954_p0 = pnand %p953_p13, %p1379_p12 }
 0x23c   : > { %p955_p1 = pneg %p954_p0 }
 0x23e   : > { %p960_p3 = pnand %p958_p2, %p955_p1 }
 0x240   : > { %963 = shalt.err (!%p960_p3)
}
 0x241   : > { %s964_s23 = sshra.s32 %s1390_s19, 4  ;;  %s975_s21 = scalar_lea.hbm %s1482_s6, 200  ;;  %s965_s23 = int_to_ptr.hbm [resolvable:$true] %s964_s23 }
 0x242   : > { %s971_s16 = scalar_lea.hbm %s965_s23, %s947_s20  ;;  %p976_p9 = scmp.lt.s32.totalorder %s965_s23, %s1482_s6 }
 0x243   : > { %p972_p4 = scmp.ne.s32.totalorder %s965_s23, %s971_s16  ;;  %p977_p10 = scmp.lt.s32.totalorder %s975_s21, %s971_s16 }
 0x245   : > { %p973_p7 = pnand %p972_p4, %p1379_p12  ;;  %p978_p11 = por %p977_p10, %p976_p9 }
 0x247   : > { %p974_p8 = pneg %p973_p7 }
 0x249   : > { %p979_p13 = pnand %p978_p11, %p974_p8 }
 0x24b   : > { %982 = shalt.err (!%p979_p13)
}
 0x24c   : > { %s1064_s1 = smov 128   ;;  %s1065_s2 = smov 8  }
 0x24d   : > { %s1497_s20 = scalar_lea.sflag [#allocation3], %s1193_s22  ;;  %s1498_s13 = sshll.u32 %s1507_s18, 7 }
 0x24e   : > { %709 = dma.vmem_to_hbm [thread:$0]  (%p1379_p12), %s1388_s0, %s1498_s13, %s1390_s19, %s1497_s20, %s1064_s1, %s1064_s1, %s1065_s2  }
 0x24f PF: > { %712 = sbr.rel (!%p1147_p5) target bundleno = 628 (0x274), region = 52  ;;  %s714_s3 = ssub.s32 (%p1147_p5), 25, %s1164_s17 }
 0x250   : > { %p715_p0 = scmp.lt.s32.totalorder (%p1147_p5), %s714_s3, 16  ;;  %s1499_s9 = scalar_lea.sflag (%p1147_p5), [#allocation5], %s1193_s22 }
 0x254   : > { %s1509_s3 = smov (!%p715_p0, %s714_s3), 16 }
 0x255   : > { %s856_s29 = sshll.u32 %s1509_s3, 3 }
 0x256   : > { %s718_s23 = ssub.s32 128, %s856_s29 }
 0x257   : > { %s719_s16 = sshll.u32 %s718_s23, 4 }
 0x258   : > { %720 = vsyncadd %s1499_s9, %s719_s16  ;;  %p1423_p12 = scmp.ne.s32.totalorder %s856_s29, 0  ;;  %s864_s11 = sshll.u32 %s1130_s28, 7 }
 0x259   : > { %s723_s8 = scalar_lea.hbm %s1483_s7, %s864_s11  ;;  %s725_s19 = sshll.u32 %s1351_s15, 4  ;;  %s1432_s19 = int_to_ptr.vmem [resolvable:$true] %s725_s19 }
 0x25a   : > { %s727_s14 = sshll.u32 %s723_s8, 4  ;;  %s860_s21 = sshll.u32 %s1509_s3, 7  ;;  %s1434_s14 = int_to_ptr.hbm [resolvable:$true] %s727_s14 }
 0x25b   : > { %s984_s1 = sshra.s32 %s1432_s19, 4  ;;  %s986_s2 = sshrl.u32 %s860_s21, 4  ;;  %s985_s1 = int_to_ptr.vmem [resolvable:$true] %s984_s1 }
 0x25c   : > { %s991_s20 = scalar_lea.vmem %s985_s1, %s986_s2  ;;  %s1066_s28 = smov [#allocation4]  }
 0x25d   : > { %p992_p5 = scmp.ne.s32.totalorder %s985_s1, %s991_s20  ;;  %s995_s13 = scalar_lea.vmem %s1066_s28, 256 }
 0x25e   : > { %p997_p3 = scmp.lt.s32.totalorder %s995_s13, %s991_s20 }
 0x25f   : > { %p993_p1 = pnand %p992_p5, %p1423_p12 }
 0x261   : > { %p994_p2 = pneg %p993_p1 }
 0x263   : > { %p999_p4 = pnand %p997_p3, %p994_p2 }
 0x265   : > { %1002 = shalt.err (!%p999_p4)
}
 0x266   : > { %s1003_s15 = sshra.s32 %s1434_s14, 4  ;;  %s1014_s9 = scalar_lea.hbm %s1483_s7, 200  ;;  %s1004_s15 = int_to_ptr.hbm [resolvable:$true] %s1003_s15 }
 0x267   : > { %s1010_s29 = scalar_lea.hbm %s1004_s15, %s986_s2  ;;  %p1015_p10 = scmp.lt.s32.totalorder %s1004_s15, %s1483_s7 }
 0x268   : > { %p1011_p7 = scmp.ne.s32.totalorder %s1004_s15, %s1010_s29  ;;  %p1016_p11 = scmp.lt.s32.totalorder %s1014_s9, %s1010_s29 }
 0x26a   : > { %p1012_p8 = pnand %p1011_p7, %p1423_p12  ;;  %p1017_p13 = por %p1016_p11, %p1015_p10 }
 0x26c   : > { %p1013_p9 = pneg %p1012_p8 }
 0x26e   : > { %p1018_p0 = pnand %p1017_p13, %p1013_p9 }
 0x270   : > { %1021 = shalt.err (!%p1018_p0)
}
 0x271   : > { %s1067_s18 = smov 128   ;;  %s1068_s8 = smov 8  }
 0x272   : > { %s1501_s1 = scalar_lea.sflag [#allocation5], %s1193_s22 }
 0x273   : > { %733 = dma.vmem_to_hbm [thread:$0]  (%p1423_p12), %s1432_s19, %s860_s21, %s1434_s14, %s1501_s1, %s1067_s18, %s1067_s18, %s1068_s8  }
 0x274 PF: > { %p906_p5 = scmp.ge.s32.totalorder %s1061_s27, 2  ;;  %s742_s2 = sand.u32 1, %s1049_s24  }
 0x275   : > { %s743_s20 = scalar_lea.sflag [#allocation3], %s742_s2 }
 0x276   : > { %p900_p1 = pnand %p906_p5, %p1151_p6 }
 0x278   : > { %p901_p2 = pneg %p900_p1 }
 0x27a   : > { %1040 = dma.done.wait (%p901_p2), %s743_s20, 2048  }
 0x27b   : > { %1042 = vsyncadd (%p901_p2), %s743_s20, 4294965248  ;;  %s753_s28 = scalar_lea.sflag [#allocation5], %s742_s2 }
 0x27c   : > { %1044 = dma.done.wait (%p901_p2), %s753_s28, 2048  }
 0x27d   : > { %1046 = vsyncadd (%p901_p2), %s753_s28, 4294965248  ;;  %p21_p12 = scmp.ge.s32.totalorder %s1134_s30, 4   ;;  %s1502_s24 = smov %s1053_s25 }
 0x27e   : > { %s1503_s25 = smov %s1057_s26  ;;  %s1504_s26 = smov %s1145_s10 }
 0x27f   : > { %s1505_s27 = smov %s1134_s30  ;;  %23 = sbr.rel (!%p21_p12) target bundleno = 10 (0xa), region = 96 }
 0x284   :  { %759 = vsyncpa [#allocation3], 1 }
 0x285   :  { %761 = vsyncpa [#allocation3 + $0x1], 1 }
 0x286   :  { %762 = vsyncpa [#allocation5], 1 }
 0x287   :  { %764 = vsyncpa [#allocation5 + $0x1], 1 }

</bundles_post_ra>
